<compile_context>
chip_gen: v5e
topology: v5e:2x2
jax: 0.10.0
libtpu: 0.0.40
codegen_flags: <defaults>
</compile_context>

<pallas_src>
import functools

import jax
import jax.numpy as jnp
from jax.experimental import pallas as pl
from jax.experimental.pallas import tpu as pltpu


def _round_up(a, b):
    return (a + b - 1) // b * b


# ----------------------------------------------------------------------------
# In-kernel conv tile: taps formed from a halo'd, lane-dense flat window
# ----------------------------------------------------------------------------
def _conv_tile(left_ref, x_ref, right_ref, w_ref, *, offsets, halo, tm):
    """f32 conv result (Cout, tm) for the current flat-M tile.

    left/x/right : (Cin, halo) | (Cin, tm) | (Cin, halo) windows of the same
                   flattened zero-padded input (Cin, N*Hp*Wp [+pad]).
    w_ref        : (taps, Cout, Cin) conv weights, tap = dy*kw + dx.
    offsets      : static flat tap offsets (dy-ph)*Wp + (dx-pw).
    """
    # One aligned lane-concat, then kh*kw static lane-shifted slices: the shift
    # rides the XLU / copy path, which has huge slack in this DMA-bound kernel.
    xwin = jnp.concatenate([left_ref[...], x_ref[...], right_ref[...]], axis=1)
    acc = None
    for tap, off in enumerate(offsets):
        xs = xwin[:, halo + off: halo + off + tm]           # static lane shift
        d = jnp.dot(w_ref[tap], xs, preferred_element_type=jnp.float32)
        acc = d if acc is None else acc + d
    return acc                                              # (Cout, tm) f32


def _conv_bias_kernel(left_ref, x_ref, right_ref, w_ref, b_ref, o_ref, *,
                      offsets, halo, tm):
    """fc=False: plain Conv2d tile (bias added), lane-dense store."""
    y = _conv_tile(left_ref, x_ref, right_ref, w_ref,
                   offsets=offsets, halo=halo, tm=tm)
    o_ref[...] = (y + b_ref[...]).astype(o_ref.dtype)


def _conv_stats_kernel(left_ref, x_ref, right_ref, w_ref, mask_ref,
                       s_ref, ss_ref, *, offsets, halo, tm):
    """fc=True pass 1: per-tile masked partial BN statistics (no conv output)."""
    y = _conv_tile(left_ref, x_ref, right_ref, w_ref,
                   offsets=offsets, halo=halo, tm=tm)
    ym = y * mask_ref[...]                                  # mask out pad/tail cols
    s_ref[0] = jnp.sum(ym, axis=-1, keepdims=True)          # (Cout, 1)
    ss_ref[0] = jnp.sum(y * ym, axis=-1, keepdims=True)     # (Cout, 1)


def _conv_norm_relu_kernel(left_ref, x_ref, right_ref, w_ref, a_ref, b_ref,
                           o_ref, *, offsets, halo, tm):
    """fc=True pass 2: conv recompute + fused BatchNorm normalize + ReLU."""
    y = _conv_tile(left_ref, x_ref, right_ref, w_ref,
                   offsets=offsets, halo=halo, tm=tm)
    o_ref[...] = jnp.maximum(y * a_ref[...] + b_ref[...], 0.0).astype(o_ref.dtype)


# ----------------------------------------------------------------------------
# Wrapper
# ----------------------------------------------------------------------------
def upconv_forward(x_nchw, w_oihw, bias, *, fc, tile_m=1024,
                   compute_dtype=jnp.float32, eps=1e-5):
    """UpConv.forward.

    fc=True : Conv2d -> BatchNorm2d(train, gamma=1, beta=0) -> ReLU -> Upsample(2x nearest)
    fc=False: Conv2d only.
    Input/output are NCHW (PyTorch convention).
    """
    N, Cin, H, W = x_nchw.shape
    Cout, _, kh, kw = w_oihw.shape
    ph, pw = kh // 2, kw // 2
    Hp, Wp = H + 2 * ph, W + 2 * pw
    taps = kh * kw
    Mg = N * Hp * Wp                    # conv output positions over padded grid
    Mv = N * H * W                      # valid output positions

    # channel-major zero-padded input, flattened once: (Cin, N*Hp*Wp)
    xp = jnp.pad(x_nchw.astype(compute_dtype),
                 ((0, 0), (0, 0), (ph, ph), (pw, pw)))
    xflat = jnp.transpose(xp, (1, 0, 2, 3)).reshape(Cin, Mg)

    # static flat tap offsets; halo = max |offset| rounded up to whole vregs
    offsets = [(dy - ph) * Wp + (dx - pw)
               for dy in range(kh) for dx in range(kw)]
    halo = _round_up(max(ph * Wp + pw, 1), 128)

    # lane-dense M tiles; tm is a multiple of halo so halo block indices are integral
    tm = max(halo, min(tile_m, _round_up(Mg, 128)))
    tm = _round_up(tm, halo)
    nm = pl.cdiv(Mg, tm)
    Mp = nm * tm
    # right guard so the last right-halo block stays in bounds; zeros are harmless
    xflat = jnp.pad(xflat, ((0, 0), (0, Mp + halo - Mg)))

    # weights folded to (taps, Cout, Cin), tap = dy*kw + dx
    wtap = jnp.transpose(w_oihw, (2, 3, 0, 1)).reshape(taps, Cout, Cin)
    wtap = wtap.astype(compute_dtype)

    bpt = tm // halo                    # halo blocks per main tile
    # Left-halo clamp at block 0 is safe: valid outputs in tile 0 never read
    # left of element 0 (m >= ph*Wp+pw); only discarded pad positions do.
    in_specs_x = [
        pl.BlockSpec((Cin, halo), lambda i: (0, jnp.maximum(i * bpt - 1, 0))),
        pl.BlockSpec((Cin, tm), lambda i: (0, i)),
        pl.BlockSpec((Cin, halo), lambda i: (0, (i + 1) * bpt)),
        pl.BlockSpec((taps, Cout, Cin), lambda i: (0, 0, 0)),
    ]
    params = pltpu.CompilerParams(dimension_semantics=("parallel",))
    static = dict(offsets=offsets, halo=halo, tm=tm)

    if not fc:
        out = pl.pallas_call(
            functools.partial(_conv_bias_kernel, **static),
            out_shape=jax.ShapeDtypeStruct((Cout, Mp), jnp.float32),
            grid=(nm,),
            in_specs=in_specs_x + [pl.BlockSpec((Cout, 1), lambda i: (0, 0))],
            out_specs=pl.BlockSpec((Cout, tm), lambda i: (0, i)),
            compiler_params=params,
        )(xflat, xflat, xflat, wtap,
          bias.reshape(Cout, 1).astype(jnp.float32))
    else:
        # mask of valid output positions on the padded grid (+ zero tail)
        rv = (jnp.arange(Hp) >= ph) & (jnp.arange(Hp) < ph + H)
        cv = (jnp.arange(Wp) >= pw) & (jnp.arange(Wp) < pw + W)
        mask = (rv[:, None] & cv[None, :]).astype(jnp.float32).reshape(-1)
        mask = jnp.pad(jnp.tile(mask, N), (0, Mp - Mg)).reshape(1, Mp)

        # ---- pass 1: streamed masked partial BN statistics ("parallel" tiles)
        s, ss = pl.pallas_call(
            functools.partial(_conv_stats_kernel, **static),
            out_shape=(jax.ShapeDtypeStruct((nm, Cout, 1), jnp.float32),
                       jax.ShapeDtypeStruct((nm, Cout, 1), jnp.float32)),
            grid=(nm,),
            in_specs=in_specs_x + [pl.BlockSpec((1, tm), lambda i: (0, i))],
            out_specs=(pl.BlockSpec((1, Cout, 1), lambda i: (i, 0, 0)),
                       pl.BlockSpec((1, Cout, 1), lambda i: (i, 0, 0))),
            compiler_params=params,
        )(xflat, xflat, xflat, wtap, mask)

        # tiny wrapper-side reduction of per-tile partials
        mean = jnp.sum(s, axis=0) / Mv                      # (Cout, 1)
        var = jnp.maximum(jnp.sum(ss, axis=0) / Mv - mean * mean, 0.0)
        inv = jax.lax.rsqrt(var + eps)
        a_scale = inv
        b_shift = -mean * inv
        # Conv bias omitted: a per-channel constant cancels under train-mode BN
        # (gamma=1, beta=0, batch stats); running stats are not tracked.

        # ---- pass 2: conv recompute + fused normalize + ReLU ("parallel" tiles)
        out = pl.pallas_call(
            functools.partial(_conv_norm_relu_kernel, **static),
            out_shape=jax.ShapeDtypeStruct((Cout, Mp), jnp.float32),
            grid=(nm,),
            in_specs=in_specs_x + [pl.BlockSpec((Cout, 1), lambda i: (0, 0)),
                                   pl.BlockSpec((Cout, 1), lambda i: (0, 0))],
            out_specs=pl.BlockSpec((Cout, tm), lambda i: (0, i)),
            compiler_params=params,
        )(xflat, xflat, xflat, wtap, a_scale, b_shift)

    # crop valid positions back out of the padded grid (data movement only)
    y = out[:, :Mg].reshape(Cout, N, Hp, Wp)[:, :, ph:ph + H, pw:pw + W]

    if fc:
        # nn.Upsample(scale_factor=2, mode='nearest'); single fused XLA copy
        # together with the NCHW transpose below.  See TODO(synk) in header.
        y = jnp.broadcast_to(y[:, :, :, None, :, None],
                             (Cout, N, H, 2, W, 2)).reshape(Cout, N, 2 * H, 2 * W)

    return jnp.transpose(y, (1, 0, 2, 3))                   # -> NCHW


# ----------------------------------------------------------------------------
# Pure-JAX reference (correctness check)
# ----------------------------------------------------------------------------
def upconv_ref(x_nchw, w_oihw, bias, *, fc):
    y = jax.lax.conv_general_dilated(
        x_nchw.astype(jnp.float32), w_oihw.astype(jnp.float32), (1, 1), "SAME",
        dimension_numbers=("NCHW", "OIHW", "NCHW"))
    y = y + bias[None, :, None, None]
    if fc:
        m = jnp.mean(y, axis=(0, 2, 3), keepdims=True)
        v = jnp.mean((y - m) ** 2, axis=(0, 2, 3), keepdims=True)
        y = jnp.maximum((y - m) * jax.lax.rsqrt(v + 1e-5), 0.0)
        y = jnp.repeat(jnp.repeat(y, 2, axis=2), 2, axis=3)
    return y


# ----------------------------------------------------------------------------
if __name__ == "__main__":
    kernel_size, Cin, Cout = 3, 4, 8
    N, H, W = 2, 16, 16

    key = jax.random.PRNGKey(0)
    kx, kwt, kb, kx2 = jax.random.split(key, 4)
    bound = 1.0 / float(Cin * kernel_size * kernel_size) ** 0.5
    w = jax.random.uniform(kwt, (Cout, Cin, kernel_size, kernel_size),
                           jnp.float32, -bound, bound)
    b = jax.random.uniform(kb, (Cout,), jnp.float32, -bound, bound)
    x = jax.random.normal(kx, (N, Cin, H, W), jnp.float32)

    # FC=True: conv -> BN(train) -> ReLU -> 2x nearest upsample
    fwd_fc = jax.jit(functools.partial(upconv_forward, fc=True))
    out_fc = jax.block_until_ready(fwd_fc(x, w, b))
    ref_fc = upconv_ref(x, w, b, fc=True)
    assert out_fc.shape == (N, Cout, 2 * H, 2 * W), out_fc.shape
    assert bool(jnp.all(jnp.isfinite(out_fc)))
    assert jnp.allclose(out_fc, ref_fc, rtol=1e-3, atol=1e-3), float(
        jnp.max(jnp.abs(out_fc - ref_fc)))

    # FC=False: plain conv
    fwd_c = jax.jit(functools.partial(upconv_forward, fc=False))
    out_c = jax.block_until_ready(fwd_c(x, w, b))
    ref_c = upconv_ref(x, w, b, fc=False)
    assert out_c.shape == (N, Cout, H, W), out_c.shape
    assert jnp.allclose(out_c, ref_c, rtol=1e-3, atol=1e-3), float(
        jnp.max(jnp.abs(out_c - ref_c)))

    # Odd spatial size: exercises the zero-padded M tail + masked BN stats.
    x2 = jax.random.normal(kx2, (N, Cin, 12, 12), jnp.float32)
    out2 = jax.block_until_ready(fwd_fc(x2, w, b))
    ref2 = upconv_ref(x2, w, b, fc=True)
    assert out2.shape == (N, Cout, 24, 24), out2.shape
    assert jnp.allclose(out2, ref2, rtol=1e-3, atol=1e-3), float(
        jnp.max(jnp.abs(out2 - ref2)))

    # bf16 streaming of the dominant operands (f32 MXU accumulation): looser tol.
    fwd_bf = jax.jit(functools.partial(upconv_forward, fc=True,
                                       compute_dtype=jnp.bfloat16))
    out_bf = jax.block_until_ready(fwd_bf(x, w, b))
    assert out_bf.shape == (N, Cout, 2 * H, 2 * W), out_bf.shape
    assert bool(jnp.all(jnp.isfinite(out_bf)))
    assert jnp.allclose(out_bf, ref_fc, rtol=5e-2, atol=5e-2), float(
        jnp.max(jnp.abs(out_bf - ref_fc)))

    print("KERNEL_OK")
</pallas_src>

<mosaic_0001>
module attributes {stable_mosaic.version = 11 : i64} {
  func.func @_conv_stats_kernel(%arg0: i32, %arg1: memref<4x128xf32, #tpu.memory_space<vmem>>, %arg2: memref<4x768xf32, #tpu.memory_space<vmem>>, %arg3: memref<4x128xf32, #tpu.memory_space<vmem>>, %arg4: memref<9x8x4xf32, #tpu.memory_space<vmem>>, %arg5: memref<1x768xf32, #tpu.memory_space<vmem>>, %arg6: memref<1x8x1xf32, #tpu.memory_space<vmem>>, %arg7: memref<1x8x1xf32, #tpu.memory_space<vmem>>) attributes {dimension_semantics = [#tpu.dimension_semantics<parallel>], iteration_bounds = array<i64: 1>, scalar_prefetch = 0 : i64, scratch_operands = 0 : i64, tpu.core_type = #tpu.core_type<tc>, window_params = [{transform_indices = @transform_0, window_bounds = array<i64: 4, 128>}, {transform_indices = @transform_1, window_bounds = array<i64: 4, 768>}, {transform_indices = @transform_2, window_bounds = array<i64: 4, 128>}, {pipeline_mode = #tpu.pipeline_mode<synchronous>, transform_indices = @transform_3, window_bounds = array<i64: 9, 8, 4>}, {transform_indices = @transform_4, window_bounds = array<i64: 1, 768>}, {transform_indices = @transform_5, window_bounds = array<i64: 1, 8, 1>}, {transform_indices = @transform_6, window_bounds = array<i64: 1, 8, 1>}]} {
    %c0 = arith.constant 0 : index
    %c0_0 = arith.constant 0 : index
    %0 = vector.load %arg1[%c0, %c0_0] : memref<4x128xf32, #tpu.memory_space<vmem>>, vector<4x128xf32>
    %c0_1 = arith.constant 0 : index
    %c0_2 = arith.constant 0 : index
    %1 = vector.load %arg2[%c0_1, %c0_2] : memref<4x768xf32, #tpu.memory_space<vmem>>, vector<4x768xf32>
    %c0_3 = arith.constant 0 : index
    %c0_4 = arith.constant 0 : index
    %2 = vector.load %arg3[%c0_3, %c0_4] : memref<4x128xf32, #tpu.memory_space<vmem>>, vector<4x128xf32>
    %3 = tpu.concatenate %0, %1, %2 in 1 : vector<4x128xf32>, vector<4x768xf32>, vector<4x128xf32> -> vector<4x1024xf32>
    %4 = vector.extract_strided_slice %3 {offsets = [0, 109], sizes = [4, 768], strides = [1, 1]} : vector<4x1024xf32> to vector<4x768xf32>
    %c0_5 = arith.constant 0 : index
    %c0_6 = arith.constant 0 : index
    %c0_7 = arith.constant 0 : index
    %5 = vector.load %arg4[%c0_5, %c0_6, %c0_7] : memref<9x8x4xf32, #tpu.memory_space<vmem>>, vector<1x8x4xf32>
    %6 = vector.shape_cast %5 : vector<1x8x4xf32> to vector<8x4xf32>
    %cst = arith.constant dense<0.000000e+00> : vector<8x768xf32>
    %7 = tpu.matmul %6, %4, %cst {dimension_numbers = #tpu.dot_dimension_numbers<[1], [0], [0], [1], [0, 0, 1, 1], [], []>} : vector<8x4xf32>, vector<4x768xf32>, vector<8x768xf32> -> vector<8x768xf32>
    %8 = vector.extract_strided_slice %3 {offsets = [0, 110], sizes = [4, 768], strides = [1, 1]} : vector<4x1024xf32> to vector<4x768xf32>
    %c1 = arith.constant 1 : index
    %c0_8 = arith.constant 0 : index
    %c0_9 = arith.constant 0 : index
    %9 = vector.load %arg4[%c1, %c0_8, %c0_9] : memref<9x8x4xf32, #tpu.memory_space<vmem>>, vector<1x8x4xf32>
    %10 = vector.shape_cast %9 : vector<1x8x4xf32> to vector<8x4xf32>
    %cst_10 = arith.constant dense<0.000000e+00> : vector<8x768xf32>
    %11 = tpu.matmul %10, %8, %cst_10 {dimension_numbers = #tpu.dot_dimension_numbers<[1], [0], [0], [1], [0, 0, 1, 1], [], []>} : vector<8x4xf32>, vector<4x768xf32>, vector<8x768xf32> -> vector<8x768xf32>
    %12 = arith.addf %7, %11 : vector<8x768xf32>
    %13 = vector.extract_strided_slice %3 {offsets = [0, 111], sizes = [4, 768], strides = [1, 1]} : vector<4x1024xf32> to vector<4x768xf32>
    %c2 = arith.constant 2 : index
    %c0_11 = arith.constant 0 : index
    %c0_12 = arith.constant 0 : index
    %14 = vector.load %arg4[%c2, %c0_11, %c0_12] : memref<9x8x4xf32, #tpu.memory_space<vmem>>, vector<1x8x4xf32>
    %15 = vector.shape_cast %14 : vector<1x8x4xf32> to vector<8x4xf32>
    %cst_13 = arith.constant dense<0.000000e+00> : vector<8x768xf32>
    %16 = tpu.matmul %15, %13, %cst_13 {dimension_numbers = #tpu.dot_dimension_numbers<[1], [0], [0], [1], [0, 0, 1, 1], [], []>} : vector<8x4xf32>, vector<4x768xf32>, vector<8x768xf32> -> vector<8x768xf32>
    %17 = arith.addf %12, %16 : vector<8x768xf32>
    %18 = vector.extract_strided_slice %3 {offsets = [0, 127], sizes = [4, 768], strides = [1, 1]} : vector<4x1024xf32> to vector<4x768xf32>
    %c3 = arith.constant 3 : index
    %c0_14 = arith.constant 0 : index
    %c0_15 = arith.constant 0 : index
    %19 = vector.load %arg4[%c3, %c0_14, %c0_15] : memref<9x8x4xf32, #tpu.memory_space<vmem>>, vector<1x8x4xf32>
    %20 = vector.shape_cast %19 : vector<1x8x4xf32> to vector<8x4xf32>
    %cst_16 = arith.constant dense<0.000000e+00> : vector<8x768xf32>
    %21 = tpu.matmul %20, %18, %cst_16 {dimension_numbers = #tpu.dot_dimension_numbers<[1], [0], [0], [1], [0, 0, 1, 1], [], []>} : vector<8x4xf32>, vector<4x768xf32>, vector<8x768xf32> -> vector<8x768xf32>
    %22 = arith.addf %17, %21 : vector<8x768xf32>
    %23 = vector.extract_strided_slice %3 {offsets = [0, 128], sizes = [4, 768], strides = [1, 1]} : vector<4x1024xf32> to vector<4x768xf32>
    %c4 = arith.constant 4 : index
    %c0_17 = arith.constant 0 : index
    %c0_18 = arith.constant 0 : index
    %24 = vector.load %arg4[%c4, %c0_17, %c0_18] : memref<9x8x4xf32, #tpu.memory_space<vmem>>, vector<1x8x4xf32>
    %25 = vector.shape_cast %24 : vector<1x8x4xf32> to vector<8x4xf32>
    %cst_19 = arith.constant dense<0.000000e+00> : vector<8x768xf32>
    %26 = tpu.matmul %25, %23, %cst_19 {dimension_numbers = #tpu.dot_dimension_numbers<[1], [0], [0], [1], [0, 0, 1, 1], [], []>} : vector<8x4xf32>, vector<4x768xf32>, vector<8x768xf32> -> vector<8x768xf32>
    %27 = arith.addf %22, %26 : vector<8x768xf32>
    %28 = vector.extract_strided_slice %3 {offsets = [0, 129], sizes = [4, 768], strides = [1, 1]} : vector<4x1024xf32> to vector<4x768xf32>
    %c5 = arith.constant 5 : index
    %c0_20 = arith.constant 0 : index
    %c0_21 = arith.constant 0 : index
    %29 = vector.load %arg4[%c5, %c0_20, %c0_21] : memref<9x8x4xf32, #tpu.memory_space<vmem>>, vector<1x8x4xf32>
    %30 = vector.shape_cast %29 : vector<1x8x4xf32> to vector<8x4xf32>
    %cst_22 = arith.constant dense<0.000000e+00> : vector<8x768xf32>
    %31 = tpu.matmul %30, %28, %cst_22 {dimension_numbers = #tpu.dot_dimension_numbers<[1], [0], [0], [1], [0, 0, 1, 1], [], []>} : vector<8x4xf32>, vector<4x768xf32>, vector<8x768xf32> -> vector<8x768xf32>
    %32 = arith.addf %27, %31 : vector<8x768xf32>
    %33 = vector.extract_strided_slice %3 {offsets = [0, 145], sizes = [4, 768], strides = [1, 1]} : vector<4x1024xf32> to vector<4x768xf32>
    %c6 = arith.constant 6 : index
    %c0_23 = arith.constant 0 : index
    %c0_24 = arith.constant 0 : index
    %34 = vector.load %arg4[%c6, %c0_23, %c0_24] : memref<9x8x4xf32, #tpu.memory_space<vmem>>, vector<1x8x4xf32>
    %35 = vector.shape_cast %34 : vector<1x8x4xf32> to vector<8x4xf32>
    %cst_25 = arith.constant dense<0.000000e+00> : vector<8x768xf32>
    %36 = tpu.matmul %35, %33, %cst_25 {dimension_numbers = #tpu.dot_dimension_numbers<[1], [0], [0], [1], [0, 0, 1, 1], [], []>} : vector<8x4xf32>, vector<4x768xf32>, vector<8x768xf32> -> vector<8x768xf32>
    %37 = arith.addf %32, %36 : vector<8x768xf32>
    %38 = vector.extract_strided_slice %3 {offsets = [0, 146], sizes = [4, 768], strides = [1, 1]} : vector<4x1024xf32> to vector<4x768xf32>
    %c7 = arith.constant 7 : index
    %c0_26 = arith.constant 0 : index
    %c0_27 = arith.constant 0 : index
    %39 = vector.load %arg4[%c7, %c0_26, %c0_27] : memref<9x8x4xf32, #tpu.memory_space<vmem>>, vector<1x8x4xf32>
    %40 = vector.shape_cast %39 : vector<1x8x4xf32> to vector<8x4xf32>
    %cst_28 = arith.constant dense<0.000000e+00> : vector<8x768xf32>
    %41 = tpu.matmul %40, %38, %cst_28 {dimension_numbers = #tpu.dot_dimension_numbers<[1], [0], [0], [1], [0, 0, 1, 1], [], []>} : vector<8x4xf32>, vector<4x768xf32>, vector<8x768xf32> -> vector<8x768xf32>
    %42 = arith.addf %37, %41 : vector<8x768xf32>
    %43 = vector.extract_strided_slice %3 {offsets = [0, 147], sizes = [4, 768], strides = [1, 1]} : vector<4x1024xf32> to vector<4x768xf32>
    %c8 = arith.constant 8 : index
    %c0_29 = arith.constant 0 : index
    %c0_30 = arith.constant 0 : index
    %44 = vector.load %arg4[%c8, %c0_29, %c0_30] : memref<9x8x4xf32, #tpu.memory_space<vmem>>, vector<1x8x4xf32>
    %45 = vector.shape_cast %44 : vector<1x8x4xf32> to vector<8x4xf32>
    %cst_31 = arith.constant dense<0.000000e+00> : vector<8x768xf32>
    %46 = tpu.matmul %45, %43, %cst_31 {dimension_numbers = #tpu.dot_dimension_numbers<[1], [0], [0], [1], [0, 0, 1, 1], [], []>} : vector<8x4xf32>, vector<4x768xf32>, vector<8x768xf32> -> vector<8x768xf32>
    %47 = arith.addf %42, %46 : vector<8x768xf32>
    %c0_32 = arith.constant 0 : index
    %c0_33 = arith.constant 0 : index
    %48 = vector.load %arg5[%c0_32, %c0_33] : memref<1x768xf32, #tpu.memory_space<vmem>>, vector<1x768xf32>
    %49 = vector.broadcast %48 : vector<1x768xf32> to vector<8x768xf32>
    %50 = arith.mulf %47, %49 : vector<8x768xf32>
    %cst_34 = arith.constant dense<0.000000e+00> : vector<8xf32>
    %51 = vector.multi_reduction <add>, %50, %cst_34 [1] : vector<8x768xf32> to vector<8xf32>
    %52 = vector.shape_cast %51 : vector<8xf32> to vector<8x1xf32>
    %c0_35 = arith.constant 0 : index
    %c0_36 = arith.constant 0 : index
    %c0_37 = arith.constant 0 : index
    %53 = vector.load %arg6[%c0_35, %c0_36, %c0_37] : memref<1x8x1xf32, #tpu.memory_space<vmem>>, vector<1x8x1xf32>
    %54 = vector.shape_cast %53 : vector<1x8x1xf32> to vector<8x1xf32>
    %55 = vector.shape_cast %52 : vector<8x1xf32> to vector<1x8x1xf32>
    tpu.vector_store %arg6[%c0_35, %c0_36, %c0_37], %55 {strides = array<i32>} : memref<1x8x1xf32, #tpu.memory_space<vmem>>, vector<1x8x1xf32>,
    %56 = arith.mulf %47, %50 : vector<8x768xf32>
    %cst_38 = arith.constant dense<0.000000e+00> : vector<8xf32>
    %57 = vector.multi_reduction <add>, %56, %cst_38 [1] : vector<8x768xf32> to vector<8xf32>
    %58 = vector.shape_cast %57 : vector<8xf32> to vector<8x1xf32>
    %c0_39 = arith.constant 0 : index
    %c0_40 = arith.constant 0 : index
    %c0_41 = arith.constant 0 : index
    %59 = vector.load %arg7[%c0_39, %c0_40, %c0_41] : memref<1x8x1xf32, #tpu.memory_space<vmem>>, vector<1x8x1xf32>
    %60 = vector.shape_cast %59 : vector<1x8x1xf32> to vector<8x1xf32>
    %61 = vector.shape_cast %58 : vector<8x1xf32> to vector<1x8x1xf32>
    tpu.vector_store %arg7[%c0_39, %c0_40, %c0_41], %61 {strides = array<i32>} : memref<1x8x1xf32, #tpu.memory_space<vmem>>, vector<1x8x1xf32>,
    return
  }
  func.func @transform_0(%arg0: i32) -> (i32, i32) {
    %c6_i32 = arith.constant 6 : i32
    %0 = arith.muli %arg0, %c6_i32 : i32
    %c1_i32 = arith.constant 1 : i32
    %1 = arith.subi %0, %c1_i32 : i32
    %c0_i32 = arith.constant 0 : i32
    %2 = arith.maxsi %1, %c0_i32 : i32
    %c0_i32_0 = arith.constant 0 : i32
    %c0_i32_1 = arith.constant 0 : i32
    return %c0_i32_0, %2 : i32, i32
  }
  func.func @transform_1(%arg0: i32) -> (i32, i32) {
    %c0_i32 = arith.constant 0 : i32
    %c0_i32_0 = arith.constant 0 : i32
    return %c0_i32, %arg0 : i32, i32
  }
  func.func @transform_2(%arg0: i32) -> (i32, i32) {
    %c1_i32 = arith.constant 1 : i32
    %0 = arith.addi %arg0, %c1_i32 : i32
    %c6_i32 = arith.constant 6 : i32
    %1 = arith.muli %0, %c6_i32 : i32
    %c0_i32 = arith.constant 0 : i32
    %c0_i32_0 = arith.constant 0 : i32
    return %c0_i32, %1 : i32, i32
  }
  func.func @transform_3(%arg0: i32) -> (i32, i32, i32) {
    %c0_i32 = arith.constant 0 : i32
    %c0_i32_0 = arith.constant 0 : i32
    %c0_i32_1 = arith.constant 0 : i32
    %c0_i32_2 = arith.constant 0 : i32
    return %c0_i32, %c0_i32_0, %c0_i32_1 : i32, i32, i32
  }
  func.func @transform_4(%arg0: i32) -> (i32, i32) {
    %c0_i32 = arith.constant 0 : i32
    %c0_i32_0 = arith.constant 0 : i32
    return %c0_i32, %arg0 : i32, i32
  }
  func.func @transform_5(%arg0: i32) -> (i32, i32, i32) {
    %c0_i32 = arith.constant 0 : i32
    %c0_i32_0 = arith.constant 0 : i32
    %c0_i32_1 = arith.constant 0 : i32
    return %arg0, %c0_i32, %c0_i32_0 : i32, i32, i32
  }
  func.func @transform_6(%arg0: i32) -> (i32, i32, i32) {
    %c0_i32 = arith.constant 0 : i32
    %c0_i32_0 = arith.constant 0 : i32
    %c0_i32_1 = arith.constant 0 : i32
    return %arg0, %c0_i32, %c0_i32_0 : i32, i32, i32
  }
}

module attributes {stable_mosaic.version = 11 : i64} {
  func.func @_conv_norm_relu_kernel(%arg0: i32, %arg1: memref<4x128xf32, #tpu.memory_space<vmem>>, %arg2: memref<4x768xf32, #tpu.memory_space<vmem>>, %arg3: memref<4x128xf32, #tpu.memory_space<vmem>>, %arg4: memref<9x8x4xf32, #tpu.memory_space<vmem>>, %arg5: memref<8x1xf32, #tpu.memory_space<vmem>>, %arg6: memref<8x1xf32, #tpu.memory_space<vmem>>, %arg7: memref<8x768xf32, #tpu.memory_space<vmem>>) attributes {dimension_semantics = [#tpu.dimension_semantics<parallel>], iteration_bounds = array<i64: 1>, scalar_prefetch = 0 : i64, scratch_operands = 0 : i64, tpu.core_type = #tpu.core_type<tc>, window_params = [{transform_indices = @transform_0, window_bounds = array<i64: 4, 128>}, {transform_indices = @transform_1, window_bounds = array<i64: 4, 768>}, {transform_indices = @transform_2, window_bounds = array<i64: 4, 128>}, {pipeline_mode = #tpu.pipeline_mode<synchronous>, transform_indices = @transform_3, window_bounds = array<i64: 9, 8, 4>}, {pipeline_mode = #tpu.pipeline_mode<synchronous>, transform_indices = @transform_4, window_bounds = array<i64: 8, 1>}, {pipeline_mode = #tpu.pipeline_mode<synchronous>, transform_indices = @transform_5, window_bounds = array<i64: 8, 1>}, {transform_indices = @transform_6, window_bounds = array<i64: 8, 768>}]} {
    %c0 = arith.constant 0 : index
    %c0_0 = arith.constant 0 : index
    %0 = vector.load %arg1[%c0, %c0_0] : memref<4x128xf32, #tpu.memory_space<vmem>>, vector<4x128xf32>
    %c0_1 = arith.constant 0 : index
    %c0_2 = arith.constant 0 : index
    %1 = vector.load %arg2[%c0_1, %c0_2] : memref<4x768xf32, #tpu.memory_space<vmem>>, vector<4x768xf32>
    %c0_3 = arith.constant 0 : index
    %c0_4 = arith.constant 0 : index
    %2 = vector.load %arg3[%c0_3, %c0_4] : memref<4x128xf32, #tpu.memory_space<vmem>>, vector<4x128xf32>
    %3 = tpu.concatenate %0, %1, %2 in 1 : vector<4x128xf32>, vector<4x768xf32>, vector<4x128xf32> -> vector<4x1024xf32>
    %4 = vector.extract_strided_slice %3 {offsets = [0, 109], sizes = [4, 768], strides = [1, 1]} : vector<4x1024xf32> to vector<4x768xf32>
    %c0_5 = arith.constant 0 : index
    %c0_6 = arith.constant 0 : index
    %c0_7 = arith.constant 0 : index
    %5 = vector.load %arg4[%c0_5, %c0_6, %c0_7] : memref<9x8x4xf32, #tpu.memory_space<vmem>>, vector<1x8x4xf32>
    %6 = vector.shape_cast %5 : vector<1x8x4xf32> to vector<8x4xf32>
    %cst = arith.constant dense<0.000000e+00> : vector<8x768xf32>
    %7 = tpu.matmul %6, %4, %cst {dimension_numbers = #tpu.dot_dimension_numbers<[1], [0], [0], [1], [0, 0, 1, 1], [], []>} : vector<8x4xf32>, vector<4x768xf32>, vector<8x768xf32> -> vector<8x768xf32>
    %8 = vector.extract_strided_slice %3 {offsets = [0, 110], sizes = [4, 768], strides = [1, 1]} : vector<4x1024xf32> to vector<4x768xf32>
    %c1 = arith.constant 1 : index
    %c0_8 = arith.constant 0 : index
    %c0_9 = arith.constant 0 : index
    %9 = vector.load %arg4[%c1, %c0_8, %c0_9] : memref<9x8x4xf32, #tpu.memory_space<vmem>>, vector<1x8x4xf32>
    %10 = vector.shape_cast %9 : vector<1x8x4xf32> to vector<8x4xf32>
    %cst_10 = arith.constant dense<0.000000e+00> : vector<8x768xf32>
    %11 = tpu.matmul %10, %8, %cst_10 {dimension_numbers = #tpu.dot_dimension_numbers<[1], [0], [0], [1], [0, 0, 1, 1], [], []>} : vector<8x4xf32>, vector<4x768xf32>, vector<8x768xf32> -> vector<8x768xf32>
    %12 = arith.addf %7, %11 : vector<8x768xf32>
    %13 = vector.extract_strided_slice %3 {offsets = [0, 111], sizes = [4, 768], strides = [1, 1]} : vector<4x1024xf32> to vector<4x768xf32>
    %c2 = arith.constant 2 : index
    %c0_11 = arith.constant 0 : index
    %c0_12 = arith.constant 0 : index
    %14 = vector.load %arg4[%c2, %c0_11, %c0_12] : memref<9x8x4xf32, #tpu.memory_space<vmem>>, vector<1x8x4xf32>
    %15 = vector.shape_cast %14 : vector<1x8x4xf32> to vector<8x4xf32>
    %cst_13 = arith.constant dense<0.000000e+00> : vector<8x768xf32>
    %16 = tpu.matmul %15, %13, %cst_13 {dimension_numbers = #tpu.dot_dimension_numbers<[1], [0], [0], [1], [0, 0, 1, 1], [], []>} : vector<8x4xf32>, vector<4x768xf32>, vector<8x768xf32> -> vector<8x768xf32>
    %17 = arith.addf %12, %16 : vector<8x768xf32>
    %18 = vector.extract_strided_slice %3 {offsets = [0, 127], sizes = [4, 768], strides = [1, 1]} : vector<4x1024xf32> to vector<4x768xf32>
    %c3 = arith.constant 3 : index
    %c0_14 = arith.constant 0 : index
    %c0_15 = arith.constant 0 : index
    %19 = vector.load %arg4[%c3, %c0_14, %c0_15] : memref<9x8x4xf32, #tpu.memory_space<vmem>>, vector<1x8x4xf32>
    %20 = vector.shape_cast %19 : vector<1x8x4xf32> to vector<8x4xf32>
    %cst_16 = arith.constant dense<0.000000e+00> : vector<8x768xf32>
    %21 = tpu.matmul %20, %18, %cst_16 {dimension_numbers = #tpu.dot_dimension_numbers<[1], [0], [0], [1], [0, 0, 1, 1], [], []>} : vector<8x4xf32>, vector<4x768xf32>, vector<8x768xf32> -> vector<8x768xf32>
    %22 = arith.addf %17, %21 : vector<8x768xf32>
    %23 = vector.extract_strided_slice %3 {offsets = [0, 128], sizes = [4, 768], strides = [1, 1]} : vector<4x1024xf32> to vector<4x768xf32>
    %c4 = arith.constant 4 : index
    %c0_17 = arith.constant 0 : index
    %c0_18 = arith.constant 0 : index
    %24 = vector.load %arg4[%c4, %c0_17, %c0_18] : memref<9x8x4xf32, #tpu.memory_space<vmem>>, vector<1x8x4xf32>
    %25 = vector.shape_cast %24 : vector<1x8x4xf32> to vector<8x4xf32>
    %cst_19 = arith.constant dense<0.000000e+00> : vector<8x768xf32>
    %26 = tpu.matmul %25, %23, %cst_19 {dimension_numbers = #tpu.dot_dimension_numbers<[1], [0], [0], [1], [0, 0, 1, 1], [], []>} : vector<8x4xf32>, vector<4x768xf32>, vector<8x768xf32> -> vector<8x768xf32>
    %27 = arith.addf %22, %26 : vector<8x768xf32>
    %28 = vector.extract_strided_slice %3 {offsets = [0, 129], sizes = [4, 768], strides = [1, 1]} : vector<4x1024xf32> to vector<4x768xf32>
    %c5 = arith.constant 5 : index
    %c0_20 = arith.constant 0 : index
    %c0_21 = arith.constant 0 : index
    %29 = vector.load %arg4[%c5, %c0_20, %c0_21] : memref<9x8x4xf32, #tpu.memory_space<vmem>>, vector<1x8x4xf32>
    %30 = vector.shape_cast %29 : vector<1x8x4xf32> to vector<8x4xf32>
    %cst_22 = arith.constant dense<0.000000e+00> : vector<8x768xf32>
    %31 = tpu.matmul %30, %28, %cst_22 {dimension_numbers = #tpu.dot_dimension_numbers<[1], [0], [0], [1], [0, 0, 1, 1], [], []>} : vector<8x4xf32>, vector<4x768xf32>, vector<8x768xf32> -> vector<8x768xf32>
    %32 = arith.addf %27, %31 : vector<8x768xf32>
    %33 = vector.extract_strided_slice %3 {offsets = [0, 145], sizes = [4, 768], strides = [1, 1]} : vector<4x1024xf32> to vector<4x768xf32>
    %c6 = arith.constant 6 : index
    %c0_23 = arith.constant 0 : index
    %c0_24 = arith.constant 0 : index
    %34 = vector.load %arg4[%c6, %c0_23, %c0_24] : memref<9x8x4xf32, #tpu.memory_space<vmem>>, vector<1x8x4xf32>
    %35 = vector.shape_cast %34 : vector<1x8x4xf32> to vector<8x4xf32>
    %cst_25 = arith.constant dense<0.000000e+00> : vector<8x768xf32>
    %36 = tpu.matmul %35, %33, %cst_25 {dimension_numbers = #tpu.dot_dimension_numbers<[1], [0], [0], [1], [0, 0, 1, 1], [], []>} : vector<8x4xf32>, vector<4x768xf32>, vector<8x768xf32> -> vector<8x768xf32>
    %37 = arith.addf %32, %36 : vector<8x768xf32>
    %38 = vector.extract_strided_slice %3 {offsets = [0, 146], sizes = [4, 768], strides = [1, 1]} : vector<4x1024xf32> to vector<4x768xf32>
    %c7 = arith.constant 7 : index
    %c0_26 = arith.constant 0 : index
    %c0_27 = arith.constant 0 : index
    %39 = vector.load %arg4[%c7, %c0_26, %c0_27] : memref<9x8x4xf32, #tpu.memory_space<vmem>>, vector<1x8x4xf32>
    %40 = vector.shape_cast %39 : vector<1x8x4xf32> to vector<8x4xf32>
    %cst_28 = arith.constant dense<0.000000e+00> : vector<8x768xf32>
    %41 = tpu.matmul %40, %38, %cst_28 {dimension_numbers = #tpu.dot_dimension_numbers<[1], [0], [0], [1], [0, 0, 1, 1], [], []>} : vector<8x4xf32>, vector<4x768xf32>, vector<8x768xf32> -> vector<8x768xf32>
    %42 = arith.addf %37, %41 : vector<8x768xf32>
    %43 = vector.extract_strided_slice %3 {offsets = [0, 147], sizes = [4, 768], strides = [1, 1]} : vector<4x1024xf32> to vector<4x768xf32>
    %c8 = arith.constant 8 : index
    %c0_29 = arith.constant 0 : index
    %c0_30 = arith.constant 0 : index
    %44 = vector.load %arg4[%c8, %c0_29, %c0_30] : memref<9x8x4xf32, #tpu.memory_space<vmem>>, vector<1x8x4xf32>
    %45 = vector.shape_cast %44 : vector<1x8x4xf32> to vector<8x4xf32>
    %cst_31 = arith.constant dense<0.000000e+00> : vector<8x768xf32>
    %46 = tpu.matmul %45, %43, %cst_31 {dimension_numbers = #tpu.dot_dimension_numbers<[1], [0], [0], [1], [0, 0, 1, 1], [], []>} : vector<8x4xf32>, vector<4x768xf32>, vector<8x768xf32> -> vector<8x768xf32>
    %47 = arith.addf %42, %46 : vector<8x768xf32>
    %c0_32 = arith.constant 0 : index
    %c0_33 = arith.constant 0 : index
    %48 = vector.load %arg5[%c0_32, %c0_33] : memref<8x1xf32, #tpu.memory_space<vmem>>, vector<8x1xf32>
    %49 = vector.broadcast %48 : vector<8x1xf32> to vector<8x768xf32>
    %50 = arith.mulf %47, %49 : vector<8x768xf32>
    %c0_34 = arith.constant 0 : index
    %c0_35 = arith.constant 0 : index
    %51 = vector.load %arg6[%c0_34, %c0_35] : memref<8x1xf32, #tpu.memory_space<vmem>>, vector<8x1xf32>
    %52 = vector.broadcast %51 : vector<8x1xf32> to vector<8x768xf32>
    %53 = arith.addf %50, %52 : vector<8x768xf32>
    %cst_36 = arith.constant 0.000000e+00 : f32
    %54 = vector.broadcast %cst_36 : f32 to vector<8x768xf32>
    %55 = arith.maximumf %53, %54 : vector<8x768xf32>
    %c0_37 = arith.constant 0 : index
    %c0_38 = arith.constant 0 : index
    %56 = vector.load %arg7[%c0_37, %c0_38] : memref<8x768xf32, #tpu.memory_space<vmem>>, vector<8x768xf32>
    tpu.vector_store %arg7[%c0_37, %c0_38], %55 {strides = array<i32>} : memref<8x768xf32, #tpu.memory_space<vmem>>, vector<8x768xf32>,
    return
  }
  func.func @transform_0(%arg0: i32) -> (i32, i32) {
    %c6_i32 = arith.constant 6 : i32
    %0 = arith.muli %arg0, %c6_i32 : i32
    %c1_i32 = arith.constant 1 : i32
    %1 = arith.subi %0, %c1_i32 : i32
    %c0_i32 = arith.constant 0 : i32
    %2 = arith.maxsi %1, %c0_i32 : i32
    %c0_i32_0 = arith.constant 0 : i32
    %c0_i32_1 = arith.constant 0 : i32
    return %c0_i32_0, %2 : i32, i32
  }
  func.func @transform_1(%arg0: i32) -> (i32, i32) {
    %c0_i32 = arith.constant 0 : i32
    %c0_i32_0 = arith.constant 0 : i32
    return %c0_i32, %arg0 : i32, i32
  }
  func.func @transform_2(%arg0: i32) -> (i32, i32) {
    %c1_i32 = arith.constant 1 : i32
    %0 = arith.addi %arg0, %c1_i32 : i32
    %c6_i32 = arith.constant 6 : i32
    %1 = arith.muli %0, %c6_i32 : i32
    %c0_i32 = arith.constant 0 : i32
    %c0_i32_0 = arith.constant 0 : i32
    return %c0_i32, %1 : i32, i32
  }
  func.func @transform_3(%arg0: i32) -> (i32, i32, i32) {
    %c0_i32 = arith.constant 0 : i32
    %c0_i32_0 = arith.constant 0 : i32
    %c0_i32_1 = arith.constant 0 : i32
    %c0_i32_2 = arith.constant 0 : i32
    return %c0_i32, %c0_i32_0, %c0_i32_1 : i32, i32, i32
  }
  func.func @transform_4(%arg0: i32) -> (i32, i32) {
    %c0_i32 = arith.constant 0 : i32
    %c0_i32_0 = arith.constant 0 : i32
    %c0_i32_1 = arith.constant 0 : i32
    return %c0_i32, %c0_i32_0 : i32, i32
  }
  func.func @transform_5(%arg0: i32) -> (i32, i32) {
    %c0_i32 = arith.constant 0 : i32
    %c0_i32_0 = arith.constant 0 : i32
    %c0_i32_1 = arith.constant 0 : i32
    return %c0_i32, %c0_i32_0 : i32, i32
  }
  func.func @transform_6(%arg0: i32) -> (i32, i32) {
    %c0_i32 = arith.constant 0 : i32
    %c0_i32_0 = arith.constant 0 : i32
    return %c0_i32, %arg0 : i32, i32
  }
}

</mosaic_0001>

<bundles_post_ra>
// kernel: tile.6
= control target key start
LH: loop header
LB: loop body
LE: loop exit
PB: predicated region body
PF: predicated region fallthrough
CT: control target
= control target key end

     0   :  { %s46_s0 = inlined_call_operand.vmem [shape: f32[324], index: 0, kind: input, shape index: {}]   ;;  %s47_s1 = inlined_call_operand.vmem [shape: f32[2,324], index: 1, kind: output, shape index: {}]  }
   0x1   :  { %v4_v0 = vld [vmem:[%s46_s0] ss:$0 sm:$0xff]  ;;  %v14_v1 = vld [vmem:[%s46_s0 + $0x1] ss:$0 sm:$0xff]  ;;  %v16_v2 = vld [vmem:[%s46_s0 + $0x2] ss:$0 sm:$0xff] }
   0x2   :  { %5 = vst [vmem:[%s47_s1] sm:$0x3] %v4_v0 }
   0x3   :  { %15 = vst [vmem:[%s47_s1 + $0x2] sm:$0x3] %v14_v1 }
   0x4   :  { %17 = vst [vmem:[%s47_s1 + $0x4] sm:$0x3] %v16_v2 }

// kernel: tile.7
= control target key start
LH: loop header
LB: loop body
LE: loop exit
PB: predicated region body
PF: predicated region fallthrough
CT: control target
= control target key end

     0   :  { %vm26_vm0 = vcmask 490496   ;;  %s51_s12 = smov 68   ;;  %s37_s15 = smov 3  ;;  %vm16_vm1 = vcmask 556032   ;;  %vm30_vm2 = vcmask 64512   ;;  %vm33_vm3 = vcmask 1048096   ;;  %s86_s0 = inlined_call_operand.vmem [shape: f32[2,324], index: 0, kind: input, shape index: {}]   ;;  %s87_s1 = inlined_call_operand.vmem [shape: f32[648], index: 1, kind: output, shape index: {}]  }
   0x1   :  { %v44_v0 = vld [vmem:[%s86_s0 + $0x4] sm:$0x3]  ;;  %v45_v1 = vld [vmem:[%s86_s0 + $0x2] sm:$0x3]  ;;  %v12_v2 = vld [vmem:[%s86_s0] sm:$0x3] }
   0x2   :  { %7 = vst [vmem:[#allocation0 + $0x10] sm:$0x3] %v44_v0  ;;  %s19_s0 = smov 3 }
   0x3   :  { %11 = vst [vmem:[#allocation0 + $0x8] sm:$0x3] %v45_v1 }
   0x4   :  { %13 = vst [vmem:[#allocation0] sm:$0x3] %v12_v2 }
   0x9   :  { %v23_v3 = vld [vmem:[#allocation0 + $0x11] sm:$0x1]   ;;  %v15_v8 = vld [vmem:[#allocation0 + $0x10] sm:$0x1]  }
   0xa   :  { %46 = vst.msk [vmem:[%s87_s1 + $0x2] sm:$0x1] %vm16_vm1, %v15_v8  }
   0xb   :  { %v25_v4 = vld [vmem:[#allocation0 + $0x1] ss:$8 sm:$0x7]   ;;  %v20_v6 = vld [vmem:[#allocation0] ss:$8 sm:%s19_s0]  }
   0xc   :  { %v27_v5 = vsel %vm26_vm0, %v25_v4, %v23_v3  ;;  %21 = vst [vmem:[%s87_s1] sm:$0x3] %v20_v6   ;;  %v38_v7 = vld [vmem:[#allocation0 + $0x1] ss:$8 sm:%s37_s15]  }
   0xd   :  { %28 = vrot.lane.b32.xlu0 %v27_v5, %s51_s12 }
  0x15   :  { %39 = vrot.lane.b32.xlu0 %v38_v7, %s51_s12 }
  0x7f   :  { %v29_v9 = vpop.permute.xlu0 %28  }
  0x80   :  { %47 = vst.msk [vmem:[%s87_s1 + $0x5] sm:$0x1] %vm30_vm2, %v29_v9  }
  0x81   :  { %48 = vst.msk [vmem:[%s87_s1 + $0x2] sm:$0x7] %vm33_vm3, %v29_v9  }
  0x87   :  { %v40_v10 = vpop.permute.xlu0 %39  }
  0x88   :  { %49 = vst.msk [vmem:[%s87_s1 + $0x3] sm:$0x3] %vm16_vm1, %v40_v10  }

// kernel: upconv_forward.2
= control target key start
LH: loop header
LB: loop body
LE: loop exit
PB: predicated region body
PF: predicated region fallthrough
CT: control target
= control target key end

     0   :  { %s1728_s27 = smov 18   ;;  %s1729_s30 = smov 19   ;;  %vm113_vm0 = vcmask 146432   ;;  %vm124_vm1 = vcmask 1043456   ;;  %vm120_vm2 = vcmask 31744   ;;  %vm271_vm3 = vcmask 154624   ;;  %s2074_s0 = inlined_call_operand.vmem [shape: f32[4,896], index: 0, kind: input, shape index: {}, may-alias: {0,1,2}]   ;;  %s2075_s1 = inlined_call_operand.vmem [shape: f32[4,896], index: 1, kind: input, shape index: {}, may-alias: {0,1,2}]   ;;  %s2076_s2 = inlined_call_operand.vmem [shape: f32[4,896], index: 2, kind: input, shape index: {}, may-alias: {0,1,2}]   ;;  %s2077_s3 = inlined_call_operand.vmem [shape: f32[9,8,4], index: 3, kind: input, shape index: {}]   ;;  %s2078_s4 = inlined_call_operand.vmem [shape: f32[1,768], index: 4, kind: input, shape index: {}]   ;;  %s2079_s5 = inlined_call_operand.vmem [shape: f32[1,8,1], index: 5, kind: output, shape index: {0}]   ;;  %s2080_s6 = inlined_call_operand.vmem [shape: f32[1,8,1], index: 6, kind: output, shape index: {1}]  }
   0x1   :  { %v76_v0 = vld [vmem:[%s2074_s0] sm:$0xf]  ;;  %v78_v2 = vld [vmem:[%s2075_s1 + $0x8] sm:$0xff]  ;;  %v79_v3 = vld [vmem:[%s2075_s1 + $0x10] sm:$0xff]  ;;  %s1730_s0 = smov 17   ;;  %s1732_s7 = smov 127  }
   0x2   :  { %v77_v1 = vld [vmem:[%s2075_s1] sm:$0xff]  ;;  %99 = vrot.lane.b32.xlu1 %v76_v0, %s1728_s27  ;;  %257 = vrot.lane.b32.xlu2 %v76_v0, %s1729_s30  ;;  %86 = vst [vmem:[#allocation1 + $0x10] ss:$2 sm:$0xff] %v78_v2  ;;  %s1731_s1 = smov 1   ;;  %v1826_v10 = vld [vmem:[%s2076_s2 + $0x18] sm:$0xf] }
   0x3   :  { %84 = vst [vmem:[#allocation1] ss:$2 sm:$0xff] %v77_v1  ;;  %s1733_s10 = smov 111   ;;  %s1734_s11 = smov 110   ;;  %v1604_v21 = vld [vmem:[%s2077_s3 + $0x8] sm:$0xff]  ;;  %v95_v33 = vld [vmem:[%s2077_s3] sm:$0xff] }
   0x4   :  { %88 = vst [vmem:[#allocation1 + $0x20] ss:$2 sm:$0xff] %v79_v3  ;;  %s1735_s13 = smov 109   ;;  %vm429_vm4 = vcmask 138240   ;;  %vm593_vm5 = vcmask 7168   ;;  %v1629_v49 = vld [vmem:[%s2077_s3 + $0x10] sm:$0xff] }
   0x5   :  { %v1642_v55 = vld [vmem:[%s2077_s3 + $0x18] sm:$0xff]  ;;  %vm901_vm6 = vcmask 1039360   ;;  %vm1065_vm7 = vcmask 908288   ;;  %vm1229_vm8 = vcmask 900096   ;;  %vm1393_vm9 = vcmask 891904  }
   0x9   :  { %v1789_v6 = vld.sshfl [vmem:[#allocation1 + $0x18] sm:$0xff pattern:$0x75316420]  ;;  %v1792_v7 = vld.sshfl [vmem:[#allocation1 + $0x10] sm:$0xff pattern:$0x75316420] }
   0xa   :  { %v1783_v4 = vld.sshfl [vmem:[#allocation1 + $0x8] sm:$0xff pattern:$0x75316420]  ;;  %v1785_v5 = vld.sshfl [vmem:[#allocation1] sm:$0xff pattern:$0x75316420]  ;;  %107 = vrot.lane.b32.xlu2 %v1789_v6, %s1728_s27 }
   0xb   :  { %103 = vrot.lane.b32.xlu0 %v1783_v4, %s1728_s27  ;;  %101 = vrot.lane.b32.xlu1 %v1785_v5, %s1728_s27  ;;  %v1794_v8 = vld.sshfl [vmem:[#allocation1 + $0x20] sm:$0xff pattern:$0x75316420]  ;;  %v1802_v9 = vld.sshfl [vmem:[#allocation1 + $0x28] sm:$0xff pattern:$0x75316420] }
  0x12   :  { %261 = vrot.lane.b32.xlu2 %v1783_v4, %s1729_s30 }
  0x13   :  { %105 = vrot.lane.b32.xlu0 %v1792_v7, %s1728_s27  ;;  %109 = vrot.lane.b32.xlu1 %v1794_v8, %s1728_s27 }
  0x1a   :  { %267 = vrot.lane.b32.xlu2 %v1794_v8, %s1729_s30 }
  0x1b   :  { %259 = vrot.lane.b32.xlu0 %v1785_v5, %s1729_s30  ;;  %265 = vrot.lane.b32.xlu1 %v1789_v6, %s1729_s30 }
  0x22   :  { %419 = vrot.lane.b32.xlu2 %v1783_v4, %s1730_s0 }
  0x23   :  { %111 = vrot.lane.b32.xlu0 %v1802_v9, %s1728_s27  ;;  %269 = vrot.lane.b32.xlu1 %v1802_v9, %s1729_s30 }
  0x2a   :  { %417 = vrot.lane.b32.xlu2 %v1785_v5, %s1730_s0 }
  0x2b   :  { %263 = vrot.lane.b32.xlu0 %v1792_v7, %s1729_s30  ;;  %415 = vrot.lane.b32.xlu1 %v76_v0, %s1730_s0 }
  0x32   :  { %581 = vrot.lane.b32.xlu2 %v1785_v5, %s1731_s1 }
  0x33   :  { %421 = vrot.lane.b32.xlu0 %v1792_v7, %s1730_s0  ;;  %579 = vrot.lane.b32.xlu1 %v76_v0, %s1731_s1 }
  0x3a   :  { %427 = vrot.lane.b32.xlu2 %v1802_v9, %s1730_s0 }
  0x3b   :  { %423 = vrot.lane.b32.xlu0 %v1789_v6, %s1730_s0  ;;  %583 = vrot.lane.b32.xlu1 %v1783_v4, %s1731_s1 }
  0x42   :  { %585 = vrot.lane.b32.xlu2 %v1792_v7, %s1731_s1 }
  0x43   :  { %425 = vrot.lane.b32.xlu0 %v1794_v8, %s1730_s0  ;;  %589 = vrot.lane.b32.xlu1 %v1794_v8, %s1731_s1 }
  0x4a   :  { %889 = vrot.lane.b32.xlu2 %v1783_v4, %s1732_s7 }
  0x4b   :  { %587 = vrot.lane.b32.xlu0 %v1789_v6, %s1731_s1  ;;  %887 = vrot.lane.b32.xlu1 %v1785_v5, %s1732_s7 }
  0x52   :  { %897 = vrot.lane.b32.xlu2 %v1802_v9, %s1732_s7 }
  0x53   :  { %591 = vrot.lane.b32.xlu0 %v1802_v9, %s1731_s1  ;;  %895 = vrot.lane.b32.xlu1 %v1794_v8, %s1732_s7 }
  0x5a   :  { %1055 = vrot.lane.b32.xlu2 %v1792_v7, %s1733_s10 }
  0x5b   :  { %891 = vrot.lane.b32.xlu0 %v1792_v7, %s1732_s7  ;;  %899 = vrot.lane.b32.xlu1 %v1826_v10, %s1732_s7 }
  0x5c   :  { %v258_v11 = vpop.permute.xlu2 %257 }
  0x62   :  { %1053 = vrot.lane.b32.xlu2 %v1783_v4, %s1733_s10 }
  0x63   :  { %893 = vrot.lane.b32.xlu0 %v1789_v6, %s1732_s7  ;;  %1051 = vrot.lane.b32.xlu1 %v1785_v5, %s1733_s10 }
  0x64   :  { %v108_v12 = vpop.permute.xlu2 %107 }
  0x6a   :  { %1217 = vrot.lane.b32.xlu2 %v1783_v4, %s1734_s11 }
  0x6b   :  { %1057 = vrot.lane.b32.xlu0 %v1789_v6, %s1733_s10  ;;  %1215 = vrot.lane.b32.xlu1 %v1785_v5, %s1734_s11 }
  0x6c   :  { %v1839_v13 = vpop.permute.xlu2 %261 }
  0x72   :  { %1063 = vrot.lane.b32.xlu2 %v1826_v10, %s1733_s10 }
  0x73   :  { %1059 = vrot.lane.b32.xlu0 %v1794_v8, %s1733_s10  ;;  %1219 = vrot.lane.b32.xlu1 %v1792_v7, %s1734_s11 }
  0x74   :  { %v100_v14 = vpop.permute.xlu1 %99  ;;  %v268_v15 = vpop.permute.xlu2 %267 }
  0x7a   :  { %1221 = vrot.lane.b32.xlu2 %v1789_v6, %s1734_s11 }
  0x7b   :  { %1061 = vrot.lane.b32.xlu0 %v1802_v9, %s1733_s10  ;;  %1225 = vrot.lane.b32.xlu1 %v1802_v9, %s1734_s11 }
  0x7c   :  { %v1852_v20 = vpop.permute.xlu2 %419 }
  0x7d   :  { %v104_v16 = vpop.permute.xlu0 %103  ;;  %v102_v17 = vpop.permute.xlu1 %101 }
  0x7e   :  { %v114_v18 = vsel %vm113_vm0, %v100_v14, %v102_v17  ;;  %v115_v19 = vsel %vm113_vm0, %v102_v17, %v104_v16 }
  0x7f   :  { %1605 = vmatpush.msk.msra.mxu0 %vm124_vm1, %v114_v18  ;;  %1607 = vmatpush.msk.msra.mxu1 %vm124_vm1, %v115_v19 }
  0x80   :  { %1606 = vmatmul.msk.f32.vlgmr.msra.gmra.mxu0 %vm120_vm2, %v1604_v21  ;;  %1608 = vmatmul.msk.f32.vlgmr.msra.gmra.mxu1 %vm120_vm2, %v1604_v21 }
  0x82   :  { %1385 = vrot.lane.b32.xlu2 %v1789_v6, %s1735_s13 }
  0x83   :  { %1223 = vrot.lane.b32.xlu0 %v1794_v8, %s1734_s11  ;;  %1383 = vrot.lane.b32.xlu1 %v1792_v7, %s1735_s13 }
  0x84   :  { %v418_v27 = vpop.permute.xlu2 %417 }
  0x85   :  { %v106_v22 = vpop.permute.xlu0 %105  ;;  %v110_v23 = vpop.permute.xlu1 %109  ;;  %v431_v41 = vsel %vm429_vm4, %v418_v27, %v1852_v20 }
  0x86   :  { %v116_v24 = vsel %vm113_vm0, %v104_v16, %v106_v22  ;;  %v117_v25 = vsel %vm113_vm0, %v106_v22, %v108_v12  ;;  %v118_v26 = vsel %vm113_vm0, %v108_v12, %v110_v23  ;;  %v1668_v16 = vld [vmem:[%s2077_s3 + $0x28] sm:$0xff] }
  0x87   :  { %1609 = vmatpush.msk.msra.mxu2 %vm124_vm1, %v116_v24  ;;  %1611 = vmatpush.msk.msra.mxu3 %vm124_vm1, %v117_v25 }
  0x88   :  { %1613 = vmatpush.msk.msrb.mxu0 %vm124_vm1, %v118_v26  ;;  %1610 = vmatmul.msk.f32.vlgmr.msra.gmra.mxu2 %vm120_vm2, %v1604_v21 }
  0x89   :  { %1612 = vmatmul.msk.f32.vlgmr.msra.gmra.mxu3 %vm120_vm2, %v1604_v21  ;;  %1614 = vmatmul.msk.f32.vlgmr.msrb.gmra.mxu0 %vm120_vm2, %v1604_v21 }
  0x8a   :  { %1387 = vrot.lane.b32.xlu2 %v1794_v8, %s1735_s13 }
  0x8b   :  { %1227 = vrot.lane.b32.xlu0 %v1826_v10, %s1734_s11  ;;  %1381 = vrot.lane.b32.xlu1 %v1783_v4, %s1735_s13 }
  0x8c   :  { %v582_v34 = vpop.permute.xlu2 %581 }
  0x8d   :  { %v260_v28 = vpop.permute.xlu0 %259  ;;  %v266_v29 = vpop.permute.xlu1 %265 }
  0x8e   :  { %v276_v30 = vsel %vm271_vm3, %v266_v29, %v268_v15  ;;  %v272_v31 = vsel %vm271_vm3, %v258_v11, %v260_v28  ;;  %v273_v32 = vsel %vm271_vm3, %v260_v28, %v1839_v13 }
  0x8f   :  { %1617 = vmatpush.msk.msrb.mxu2 %vm124_vm1, %v272_v31  ;;  %1619 = vmatpush.msk.msrb.mxu3 %vm124_vm1, %v273_v32 }
  0x90   :  { %1618 = vmatmul.msk.f32.vlgmr.msrb.gmra.mxu2 %vm120_vm2, %v95_v33 }
  0x91   :  { %1625 = vmatpush.msk.msra.mxu2 %vm124_vm1, %v276_v30  ;;  %1620 = vmatmul.msk.f32.vlgmr.msrb.gmra.mxu3 %vm120_vm2, %v95_v33 }
  0x93   :  { %1379 = vrot.lane.b32.xlu0 %v1785_v5, %s1735_s13  ;;  %1391 = vrot.lane.b32.xlu1 %v1826_v10, %s1735_s13 }
  0x94   :  { %v428_v39 = vpop.permute.xlu2 %427 }
  0x95   :  { %v112_v35 = vpop.permute.xlu0 %111  ;;  %v270_v36 = vpop.permute.xlu1 %269 }
  0x96   :  { %v277_v37 = vsel %vm271_vm3, %v268_v15, %v270_v36  ;;  %v119_v38 = vsel %vm113_vm0, %v110_v23, %v112_v35 }
  0x97   :  { %1615 = vmatpush.msk.msrb.mxu1 %vm124_vm1, %v119_v38  ;;  %1627 = vmatpush.msk.msra.mxu3 %vm124_vm1, %v277_v37 }
  0x98   :  { %1616 = vmatmul.msk.f32.vlgmr.msrb.gmra.mxu1 %vm120_vm2, %v1604_v21  ;;  %1626 = vmatmul.msk.f32.vlgmr.msra.gmra.mxu2 %vm120_vm2, %v95_v33 }
  0x99   :  { %1628 = vmatmul.msk.f32.vlgmr.msra.gmra.mxu3 %vm120_vm2, %v95_v33 }
  0x9b   :  { %1389 = vrot.lane.b32.xlu0 %v1802_v9, %s1735_s13 }
  0x9c   :  { %v586_v46 = vpop.permute.xlu2 %585 }
  0x9d   :  { %v264_v40 = vpop.permute.xlu0 %263  ;;  %v416_v42 = vpop.permute.xlu1 %415 }
  0x9e   :  { %v274_v43 = vsel %vm271_vm3, %v1839_v13, %v264_v40  ;;  %v275_v44 = vsel %vm271_vm3, %v264_v40, %v266_v29  ;;  %v430_v45 = vsel %vm429_vm4, %v416_v42, %v418_v27  ;;  %v1655_v13 = vld [vmem:[%s2077_s3 + $0x20] sm:$0xff]  ;;  %v1681_v27 = vld [vmem:[%s2077_s3 + $0x30] sm:$0xff] }
  0x9f   :  { %1621 = vmatpush.msk.msra.mxu0 %vm124_vm1, %v274_v43  ;;  %1623 = vmatpush.msk.msra.mxu1 %vm124_vm1, %v275_v44 }
  0xa0   :  { %1622 = vmatmul.msk.f32.vlgmr.msra.gmra.mxu0 %vm120_vm2, %v95_v33  ;;  %1624 = vmatmul.msk.f32.vlgmr.msra.gmra.mxu1 %vm120_vm2, %v95_v33 }
  0xa1   :  { %1632 = vmatpush.msk.msrb.mxu1 %vm124_vm1, %v431_v41  ;;  %1630 = vmatpush.msk.msrb.mxu0 %vm124_vm1, %v430_v45 }
  0xa4   :  { %v890_v52 = vpop.permute.xlu2 %889 }
  0xa5   :  { %v422_v47 = vpop.permute.xlu0 %421  ;;  %v580_v48 = vpop.permute.xlu1 %579 }
  0xa6   :  { %v432_v50 = vsel %vm429_vm4, %v1852_v20, %v422_v47  ;;  %v594_v51 = vsel %vm593_vm5, %v580_v48, %v582_v34 }
  0xa7   :  { %1634 = vmatpush.msk.msrb.mxu2 %vm124_vm1, %v432_v50  ;;  %v1707_v50 = vld [vmem:[%s2077_s3 + $0x40] sm:$0xff] }
  0xa8   :  { %1635 = vmatmul.msk.f32.vlgmr.msrb.gmra.mxu2 %vm120_vm2, %v1629_v49  ;;  %1631 = vmatmul.msk.f32.vlgmr.msrb.gmra.mxu0 %vm120_vm2, %v1629_v49 }
  0xa9   :  { %1643 = vmatpush.msk.msra.mxu2 %vm124_vm1, %v594_v51  ;;  %1633 = vmatmul.msk.f32.vlgmr.msrb.gmra.mxu1 %vm120_vm2, %v1629_v49 }
  0xac   :  { %v898_v58 = vpop.permute.xlu2 %897 }
  0xad   :  { %v424_v53 = vpop.permute.xlu0 %423  ;;  %v584_v54 = vpop.permute.xlu1 %583 }
  0xae   :  { %v433_v56 = vsel %vm429_vm4, %v422_v47, %v424_v53  ;;  %v595_v57 = vsel %vm593_vm5, %v582_v34, %v584_v54  ;;  %v596_v63 = vsel %vm593_vm5, %v584_v54, %v586_v46  ;;  %v1694_v34 = vld [vmem:[%s2077_s3 + $0x38] sm:$0xff] }
  0xaf   :  { %1636 = vmatpush.msk.msrb.mxu3 %vm124_vm1, %v433_v56 }
  0xb0   :  { %1637 = vmatmul.msk.f32.vlgmr.msrb.gmra.mxu3 %vm120_vm2, %v1629_v49  ;;  %1644 = vmatmul.msk.f32.vlgmr.msra.gmra.mxu2 %vm120_vm2, %v1642_v55 }
  0xb1   :  { %1645 = vmatpush.msk.msra.mxu3 %vm124_vm1, %v595_v57 }
  0xb4   :  { %v1056_v10 = vpop.permute.xlu2 %1055 }
  0xb5   :  { %v426_v59 = vpop.permute.xlu0 %425  ;;  %v590_v60 = vpop.permute.xlu1 %589 }
  0xb6   :  { %v434_v61 = vsel %vm429_vm4, %v424_v53, %v426_v59  ;;  %v435_v62 = vsel %vm429_vm4, %v426_v59, %v428_v39 }
  0xb7   :  { %1638 = vmatpush.msk.msra.mxu0 %vm124_vm1, %v434_v61  ;;  %1640 = vmatpush.msk.msra.mxu1 %vm124_vm1, %v435_v62 }
  0xb8   :  { %1639 = vmatmul.msk.f32.vlgmr.msra.gmra.mxu0 %vm120_vm2, %v1629_v49  ;;  %1641 = vmatmul.msk.f32.vlgmr.msra.gmra.mxu1 %vm120_vm2, %v1629_v49 }
  0xb9   :  { %1646 = vmatmul.msk.f32.vlgmr.msra.gmra.mxu3 %vm120_vm2, %v1642_v55  ;;  %1647 = vmatpush.msk.msrb.mxu0 %vm124_vm1, %v596_v63 }
  0xbb   :  { %1656 = vmatpush.msk.msra.mxu0 %vm124_vm1, %v1785_v5 }
  0xbd   :  { %v588_v0 = vpop.permute.xlu0 %587  ;;  %v888_v1 = vpop.permute.xlu1 %887 }
  0xbe   :  { %v597_v2 = vsel %vm593_vm5, %v586_v46, %v588_v0  ;;  %v598_v3 = vsel %vm593_vm5, %v588_v0, %v590_v60  ;;  %v902_v11 = vsel %vm901_vm6, %v888_v1, %v890_v52 }
  0xbf   :  { %1649 = vmatpush.msk.msrb.mxu1 %vm124_vm1, %v597_v2  ;;  %1651 = vmatpush.msk.msrb.mxu2 %vm124_vm1, %v598_v3 }
  0xc0   :  { %1648 = vmatmul.msk.f32.vlgmr.msrb.gmra.mxu0 %vm120_vm2, %v1642_v55  ;;  %1650 = vmatmul.msk.f32.vlgmr.msrb.gmra.mxu1 %vm120_vm2, %v1642_v55 }
  0xc1   :  { %1652 = vmatmul.msk.f32.vlgmr.msrb.gmra.mxu2 %vm120_vm2, %v1642_v55  ;;  %1658 = vmatpush.msk.msra.mxu1 %vm124_vm1, %v1783_v4 }
  0xc2   :  { %1660 = vmatpush.msk.msra.mxu2 %vm124_vm1, %v1792_v7  ;;  %1664 = vmatpush.msk.msrb.mxu0 %vm124_vm1, %v1794_v8  ;;  %v1054_v7 = vpop.permute.xlu2 %1053 }
  0xc3   :  { %1666 = vmatpush.msk.msrb.mxu1 %vm124_vm1, %v1802_v9  ;;  %v1067_v22 = vsel %vm1065_vm7, %v1054_v7, %v1056_v10 }
  0xc4   :  { %1669 = vmatpush.msk.msrb.mxu2 %vm124_vm1, %v902_v11 }
  0xc5   :  { %v592_v5 = vpop.permute.xlu0 %591  ;;  %v896_v12 = vpop.permute.xlu1 %895 }
  0xc6   :  { %v599_v14 = vsel %vm593_vm5, %v590_v60, %v592_v5  ;;  %v906_v4 = vsel %vm901_vm6, %v896_v12, %v898_v58 }
  0xc7   :  { %1653 = vmatpush.msk.msrb.mxu3 %vm124_vm1, %v599_v14 }
  0xc8   :  { %1654 = vmatmul.msk.f32.vlgmr.msrb.gmra.mxu3 %vm120_vm2, %v1642_v55  ;;  %1657 = vmatmul.msk.f32.vlgmr.msra.gmra.mxu0 %vm120_vm2, %v1655_v13 }
  0xc9   :  { %1659 = vmatmul.msk.f32.vlgmr.msra.gmra.mxu1 %vm120_vm2, %v1655_v13  ;;  %1661 = vmatmul.msk.f32.vlgmr.msra.gmra.mxu2 %vm120_vm2, %v1655_v13 }
  0xca   :  { %1662 = vmatpush.msk.msra.mxu3 %vm124_vm1, %v1789_v6  ;;  %1677 = vmatpush.msk.msra.mxu2 %vm124_vm1, %v906_v4  ;;  %v1218_v6 = vpop.permute.xlu2 %1217 }
  0xcd   :  { %v892_v8 = vpop.permute.xlu0 %891  ;;  %v900_v9 = vpop.permute.xlu1 %899 }
  0xce   :  { %v903_v15 = vsel %vm901_vm6, %v890_v52, %v892_v8  ;;  %v907_v17 = vsel %vm901_vm6, %v898_v58, %v900_v9 }
  0xcf   :  { %1671 = vmatpush.msk.msrb.mxu3 %vm124_vm1, %v903_v15 }
  0xd0   :  { %1663 = vmatmul.msk.f32.vlgmr.msra.gmra.mxu3 %vm120_vm2, %v1655_v13  ;;  %1665 = vmatmul.msk.f32.vlgmr.msrb.gmra.mxu0 %vm120_vm2, %v1655_v13 }
  0xd1   :  { %1667 = vmatmul.msk.f32.vlgmr.msrb.gmra.mxu1 %vm120_vm2, %v1655_v13  ;;  %1670 = vmatmul.msk.f32.vlgmr.msrb.gmra.mxu2 %vm120_vm2, %v1668_v16 }
  0xd2   :  { %1679 = vmatpush.msk.msra.mxu3 %vm124_vm1, %v907_v17  ;;  %v1064_v24 = vpop.permute.xlu2 %1063 }
  0xd5   :  { %v894_v18 = vpop.permute.xlu0 %893  ;;  %v1052_v19 = vpop.permute.xlu1 %1051 }
  0xd6   :  { %v904_v20 = vsel %vm901_vm6, %v892_v8, %v894_v18  ;;  %v905_v21 = vsel %vm901_vm6, %v894_v18, %v896_v12  ;;  %v1066_v23 = vsel %vm1065_vm7, %v1052_v19, %v1054_v7 }
  0xd7   :  { %1673 = vmatpush.msk.msra.mxu0 %vm124_vm1, %v904_v20  ;;  %1675 = vmatpush.msk.msra.mxu1 %vm124_vm1, %v905_v21 }
  0xd8   :  { %1672 = vmatmul.msk.f32.vlgmr.msrb.gmra.mxu3 %vm120_vm2, %v1668_v16  ;;  %1674 = vmatmul.msk.f32.vlgmr.msra.gmra.mxu0 %vm120_vm2, %v1668_v16 }
  0xd9   :  { %1676 = vmatmul.msk.f32.vlgmr.msra.gmra.mxu1 %vm120_vm2, %v1668_v16  ;;  %1678 = vmatmul.msk.f32.vlgmr.msra.gmra.mxu2 %vm120_vm2, %v1668_v16 }
  0xda   :  { %1684 = vmatpush.msk.msrb.mxu1 %vm124_vm1, %v1067_v22  ;;  %1682 = vmatpush.msk.msrb.mxu0 %vm124_vm1, %v1066_v23  ;;  %v1222_v35 = vpop.permute.xlu2 %1221 }
  0xdd   :  { %v1058_v25 = vpop.permute.xlu0 %1057  ;;  %v1216_v26 = vpop.permute.xlu1 %1215 }
  0xde   :  { %v1068_v28 = vsel %vm1065_vm7, %v1056_v10, %v1058_v25  ;;  %v1230_v29 = vsel %vm1229_vm8, %v1216_v26, %v1218_v6 }
  0xdf   :  { %1686 = vmatpush.msk.msrb.mxu2 %vm124_vm1, %v1068_v28 }
  0xe0   :  { %1680 = vmatmul.msk.f32.vlgmr.msra.gmra.mxu3 %vm120_vm2, %v1668_v16  ;;  %1683 = vmatmul.msk.f32.vlgmr.msrb.gmra.mxu0 %vm120_vm2, %v1681_v27 }
  0xe1   :  { %1685 = vmatmul.msk.f32.vlgmr.msrb.gmra.mxu1 %vm120_vm2, %v1681_v27  ;;  %1687 = vmatmul.msk.f32.vlgmr.msrb.gmra.mxu2 %vm120_vm2, %v1681_v27 }
  0xe2   :  { %1695 = vmatpush.msk.msra.mxu2 %vm124_vm1, %v1230_v29  ;;  %v1386_v41 = vpop.permute.xlu2 %1385 }
  0xe5   :  { %v1060_v30 = vpop.permute.xlu0 %1059  ;;  %v1220_v31 = vpop.permute.xlu1 %1219 }
  0xe6   :  { %v1069_v32 = vsel %vm1065_vm7, %v1058_v25, %v1060_v30  ;;  %v1231_v33 = vsel %vm1229_vm8, %v1218_v6, %v1220_v31  ;;  %v1232_v40 = vsel %vm1229_vm8, %v1220_v31, %v1222_v35 }
  0xe7   :  { %1688 = vmatpush.msk.msrb.mxu3 %vm124_vm1, %v1069_v32 }
  0xe8   :  { %1689 = vmatmul.msk.f32.vlgmr.msrb.gmra.mxu3 %vm120_vm2, %v1681_v27 }
  0xe9   :  { %1696 = vmatmul.msk.f32.vlgmr.msra.gmra.mxu2 %vm120_vm2, %v1694_v34  ;;  %1697 = vmatpush.msk.msra.mxu3 %vm124_vm1, %v1231_v33 }
  0xea   :  { %v1388_v47 = vpop.permute.xlu2 %1387 }
  0xeb   :  { %v1397_v52 = vsel %vm1393_vm9, %v1386_v41, %v1388_v47 }
  0xed   :  { %v1062_v36 = vpop.permute.xlu0 %1061  ;;  %v1226_v37 = vpop.permute.xlu1 %1225 }
  0xee   :  { %v1070_v38 = vsel %vm1065_vm7, %v1060_v30, %v1062_v36  ;;  %v1071_v39 = vsel %vm1065_vm7, %v1062_v36, %v1064_v24 }
  0xef   :  { %1690 = vmatpush.msk.msra.mxu0 %vm124_vm1, %v1070_v38  ;;  %1692 = vmatpush.msk.msra.mxu1 %vm124_vm1, %v1071_v39 }
  0xf0   :  { %1691 = vmatmul.msk.f32.vlgmr.msra.gmra.mxu0 %vm120_vm2, %v1681_v27  ;;  %1693 = vmatmul.msk.f32.vlgmr.msra.gmra.mxu1 %vm120_vm2, %v1681_v27 }
  0xf1   :  { %1698 = vmatmul.msk.f32.vlgmr.msra.gmra.mxu3 %vm120_vm2, %v1694_v34  ;;  %1699 = vmatpush.msk.msrb.mxu0 %vm124_vm1, %v1232_v40 }
  0xf5   :  { %v1224_v42 = vpop.permute.xlu0 %1223  ;;  %v1384_v43 = vpop.permute.xlu1 %1383 }
  0xf6   :  { %v1233_v44 = vsel %vm1229_vm8, %v1222_v35, %v1224_v42  ;;  %v1234_v45 = vsel %vm1229_vm8, %v1224_v42, %v1226_v37  ;;  %v1396_v46 = vsel %vm1393_vm9, %v1384_v43, %v1386_v41 }
  0xf7   :  { %1701 = vmatpush.msk.msrb.mxu1 %vm124_vm1, %v1233_v44  ;;  %1703 = vmatpush.msk.msrb.mxu2 %vm124_vm1, %v1234_v45 }
  0xf8   :  { %1700 = vmatmul.msk.f32.vlgmr.msrb.gmra.mxu0 %vm120_vm2, %v1694_v34  ;;  %1702 = vmatmul.msk.f32.vlgmr.msrb.gmra.mxu1 %vm120_vm2, %v1694_v34 }
  0xf9   :  { %1704 = vmatmul.msk.f32.vlgmr.msrb.gmra.mxu2 %vm120_vm2, %v1694_v34 }
  0xfa   :  { %1712 = vmatpush.msk.msra.mxu2 %vm124_vm1, %v1396_v46 }
  0xfd   :  { %v1228_v48 = vpop.permute.xlu0 %1227  ;;  %v1382_v49 = vpop.permute.xlu1 %1381 }
  0xfe   :  { %v1235_v51 = vsel %vm1229_vm8, %v1226_v37, %v1228_v48  ;;  %v1395_v53 = vsel %vm1393_vm9, %v1382_v49, %v1384_v43  ;;  %v154_v56 = vpop.f32.mrf.mxu0  ;;  %v174_v57 = vpop.f32.mrf.mxu1 }
  0xff   :  { %1705 = vmatpush.msk.msrb.mxu3 %vm124_vm1, %v1235_v51  ;;  %1710 = vmatpush.msk.msra.mxu1 %vm124_vm1, %v1395_v53 }
 0x100   :  { %1706 = vmatmul.msk.f32.vlgmr.msrb.gmra.mxu3 %vm120_vm2, %v1694_v34  ;;  %1711 = vmatmul.msk.f32.vlgmr.msra.gmra.mxu1 %vm120_vm2, %v1707_v50 }
 0x101   :  { %1713 = vmatmul.msk.f32.vlgmr.msra.gmra.mxu2 %vm120_vm2, %v1707_v50  ;;  %1714 = vmatpush.msk.msra.mxu3 %vm124_vm1, %v1397_v52 }
 0x105   :  { %v1380_v54 = vpop.permute.xlu0 %1379  ;;  %v1392_v58 = vpop.permute.xlu1 %1391 }
 0x106   :  { %v1394_v55 = vsel %vm1393_vm9, %v1380_v54, %v1382_v49  ;;  %v234_v0 = vpop.f32.mrf.mxu0 }
 0x107   :  { %1708 = vmatpush.msk.msra.mxu0 %vm124_vm1, %v1394_v55 }
 0x108   :  { %1709 = vmatmul.msk.f32.vlgmr.msra.gmra.mxu0 %vm120_vm2, %v1707_v50  ;;  %1715 = vmatmul.msk.f32.vlgmr.msra.gmra.mxu3 %vm120_vm2, %v1707_v50 }
 0x10b   :  { %v194_v59 = vpop.f32.mrf.mxu2 }
 0x10c   :  { %v214_v60 = vpop.f32.mrf.mxu3 }
 0x10d   :  { %v1390_v61 = vpop.permute.xlu0 %1389 }
 0x10e   :  { %v1398_v62 = vsel %vm1393_vm9, %v1388_v47, %v1390_v61  ;;  %v1399_v63 = vsel %vm1393_vm9, %v1390_v61, %v1392_v58 }
 0x10f   :  { %1716 = vmatpush.msk.msrb.mxu0 %vm124_vm1, %v1398_v62  ;;  %1718 = vmatpush.msk.msrb.mxu1 %vm124_vm1, %v1399_v63 }
 0x110   :  { %1717 = vmatmul.msk.f32.vlgmr.msrb.gmra.mxu0 %vm120_vm2, %v1707_v50  ;;  %1719 = vmatmul.msk.f32.vlgmr.msrb.gmra.mxu1 %vm120_vm2, %v1707_v50 }
 0x113   :  { %v310_v1 = vpop.f32.mrf.mxu2 }
 0x114   :  { %v330_v2 = vpop.f32.mrf.mxu3  ;;  %v311_v3 = vadd.f32 %v310_v1, %v154_v56 }
 0x115   :  { %v254_v10 = vpop.f32.mrf.mxu1  ;;  %v331_v11 = vadd.f32 %v330_v2, %v174_v57 }
 0x11b   :  { %v390_v5 = vpop.f32.mrf.mxu2 }
 0x11c   :  { %v410_v12 = vpop.f32.mrf.mxu3  ;;  %v391_v13 = vadd.f32 %v390_v5, %v234_v0  ;;  %v1541_v0 = vld [vmem:[%s2078_s4] sm:$0x3f] }
 0x11d   :  { %v411_v14 = vadd.f32 %v410_v12, %v254_v10  ;;  %v350_v4 = vpop.f32.mrf.mxu0  ;;  %v370_v7 = vpop.f32.mrf.mxu1 }
 0x11e   :  { %v351_v8 = vadd.f32 %v350_v4, %v194_v59  ;;  %v371_v9 = vadd.f32 %v370_v7, %v214_v60 }
 0x125   :  { %v468_v16 = vpop.f32.mrf.mxu0 }
 0x126   :  { %v488_v15 = vpop.f32.mrf.mxu1  ;;  %v571_v50 = vadd.f32 %v468_v16, %v311_v3 }
 0x127   :  { %v572_v44 = vadd.f32 %v488_v15, %v331_v11 }
 0x12b   :  { %v508_v17 = vpop.f32.mrf.mxu2 }
 0x12c   :  { %v573_v49 = vadd.f32 %v508_v17, %v351_v8  ;;  %v1544_v8 = vperm.slane %v1541_v0, 1 }
 0x133   :  { %v528_v18 = vpop.f32.mrf.mxu3  ;;  %v632_v20 = vpop.f32.mrf.mxu2 }
 0x134   :  { %v735_v54 = vadd.f32 %v632_v20, %v571_v50  ;;  %v574_v58 = vadd.f32 %v528_v18, %v371_v9  ;;  %v1543_v18 = vperm.slane %v1541_v0, 0 }
 0x135   :  { %v568_v6 = vpop.f32.mrf.mxu1  ;;  %v548_v19 = vpop.f32.mrf.mxu0 }
 0x136   :  { %v576_v61 = vadd.f32 %v568_v6, %v411_v14  ;;  %v575_v10 = vadd.f32 %v548_v19, %v391_v13  ;;  %v1545_v6 = vperm.slane %v1541_v0, 2 }
 0x13c   :  { %v652_v22 = vpop.f32.mrf.mxu3 }
 0x13d   :  { %v692_v21 = vpop.f32.mrf.mxu1  ;;  %v672_v23 = vpop.f32.mrf.mxu0  ;;  %v736_v47 = vadd.f32 %v652_v22, %v572_v44 }
 0x13e   :  { %v737_v52 = vadd.f32 %v672_v23, %v573_v49  ;;  %v738_v1 = vadd.f32 %v692_v21, %v574_v58 }
 0x144   :  { %v712_v24 = vpop.f32.mrf.mxu2 }
 0x145   :  { %v775_v28 = vpop.f32.mrf.mxu0  ;;  %v739_v9 = vadd.f32 %v712_v24, %v575_v10 }
 0x146   :  { %v795_v25 = vpop.f32.mrf.mxu1  ;;  %v878_v59 = vadd.f32 %v775_v28, %v735_v54 }
 0x147   :  { %v879_v48 = vadd.f32 %v795_v25, %v736_v47  ;;  %v1547_v47 = vperm.slane %v1541_v0, 4 }
 0x14b   :  { %v732_v26 = vpop.f32.mrf.mxu3 }
 0x14c   :  { %v815_v27 = vpop.f32.mrf.mxu2  ;;  %v740_v11 = vadd.f32 %v732_v26, %v576_v61 }
 0x14d   :  { %v855_v32 = vpop.f32.mrf.mxu0  ;;  %v880_v56 = vadd.f32 %v815_v27, %v737_v52 }
 0x14e   :  { %v875_v29 = vpop.f32.mrf.mxu1  ;;  %v882_v20 = vadd.f32 %v855_v32, %v739_v9 }
 0x14f   :  { %v883_v22 = vadd.f32 %v875_v29, %v740_v11 }
 0x153   :  { %v835_v30 = vpop.f32.mrf.mxu3 }
 0x154   :  { %v940_v31 = vpop.f32.mrf.mxu2  ;;  %v881_v12 = vadd.f32 %v835_v30, %v738_v1 }
 0x155   :  { %v980_v36 = vpop.f32.mrf.mxu0  ;;  %v1043_v2 = vadd.f32 %v940_v31, %v878_v59 }
 0x156   :  { %v1000_v33 = vpop.f32.mrf.mxu1  ;;  %v1045_v62 = vadd.f32 %v980_v36, %v880_v56  ;;  %v1546_v36 = vperm.slane %v1541_v0, 3 }
 0x157   :  { %v1046_v25 = vadd.f32 %v1000_v33, %v881_v12 }
 0x15b   :  { %v960_v34 = vpop.f32.mrf.mxu3 }
 0x15c   :  { %v1020_v35 = vpop.f32.mrf.mxu2  ;;  %v1044_v51 = vadd.f32 %v960_v34, %v879_v48  ;;  %v1548_v48 = vperm.slane %v1541_v0, 5 }
 0x15d   :  { %v1104_v40 = vpop.f32.mrf.mxu0  ;;  %v1047_v19 = vadd.f32 %v1020_v35, %v882_v20 }
 0x15e   :  { %v1124_v37 = vpop.f32.mrf.mxu1  ;;  %v1207_v4 = vadd.f32 %v1104_v40, %v1043_v2 }
 0x15f   :  { %v1208_v60 = vadd.f32 %v1124_v37, %v1044_v51 }
 0x163   :  { %v1040_v38 = vpop.f32.mrf.mxu3 }
 0x164   :  { %v1144_v39 = vpop.f32.mrf.mxu2  ;;  %v1048_v26 = vadd.f32 %v1040_v38, %v883_v22 }
 0x165   :  { %v1209_v5 = vadd.f32 %v1144_v39, %v1045_v62 }
 0x16b   :  { %v1164_v42 = vpop.f32.mrf.mxu3 }
 0x16c   :  { %v1268_v45 = vpop.f32.mrf.mxu2  ;;  %v1210_v28 = vadd.f32 %v1164_v42, %v1046_v25 }
 0x16d   :  { %v1204_v41 = vpop.f32.mrf.mxu1  ;;  %v1184_v43 = vpop.f32.mrf.mxu0  ;;  %v1371_v14 = vadd.f32 %v1268_v45, %v1207_v4 }
 0x16e   :  { %v1211_v34 = vadd.f32 %v1184_v43, %v1047_v19  ;;  %v1212_v24 = vadd.f32 %v1204_v41, %v1048_v26 }
 0x174   :  { %v1288_v53 = vpop.f32.mrf.mxu3 }
 0x175   :  { %v1328_v46 = vpop.f32.mrf.mxu1  ;;  %v1308_v57 = vpop.f32.mrf.mxu0  ;;  %v1372_v3 = vadd.f32 %v1288_v53, %v1208_v60 }
 0x176   :  { %v1373_v15 = vadd.f32 %v1308_v57, %v1209_v5  ;;  %v1374_v37 = vadd.f32 %v1328_v46, %v1210_v28 }
 0x17c   :  { %v1348_v55 = vpop.f32.mrf.mxu2 }
 0x17d   :  { %v1452_v63 = vpop.f32.mrf.mxu1  ;;  %v1375_v45 = vadd.f32 %v1348_v55, %v1211_v34 }
 0x17e   :  { %v1536_v7 = vadd.f32 %v1452_v63, %v1372_v3 }
 0x180   :  { %v1556_v27 = vmul.f32 %v1544_v8, %v1536_v7 }
 0x182   :  { %v1570_v39 = vmul.f32 %v1556_v27, %v1536_v7 }
 0x183   :  { %v1368_v16 = vpop.f32.mrf.mxu3 }
 0x184   :  { %v1472_v17 = vpop.f32.mrf.mxu2  ;;  %v1376_v32 = vadd.f32 %v1368_v16, %v1212_v24 }
 0x185   :  { %v1537_v23 = vadd.f32 %v1472_v17, %v1373_v15  ;;  %v1432_v21 = vpop.f32.mrf.mxu0 }
 0x186   :  { %v1535_v13 = vadd.f32 %v1432_v21, %v1371_v14 }
 0x187   :  { %v1557_v30 = vmul.f32 %v1545_v6, %v1537_v23 }
 0x188   :  { %v1555_v31 = vmul.f32 %v1543_v18, %v1535_v13 }
 0x189   :  { %v1571_v33 = vmul.f32 %v1557_v30, %v1537_v23 }
 0x18a   :  { %v1561_v40 = vadd.f32 %v1556_v27, %v1555_v31  ;;  %v1569_v44 = vmul.f32 %v1555_v31, %v1535_v13 }
 0x18b   :  { %v1492_v29 = vpop.f32.mrf.mxu3 }
 0x18c   :  { %v1575_v49 = vadd.f32 %v1570_v39, %v1569_v44  ;;  %v1538_v50 = vadd.f32 %v1492_v29, %v1374_v37  ;;  %v1562_v35 = vadd.f32 %v1561_v40, %v1557_v30 }
 0x18d   :  { %v1512_v38 = vpop.f32.mrf.mxu0  ;;  %v1532_v42 = vpop.f32.mrf.mxu1 }
 0x18e   :  { %v1558_v51 = vmul.f32 %v1546_v36, %v1538_v50  ;;  %v1576_v52 = vadd.f32 %v1575_v49, %v1571_v33  ;;  %v1539_v43 = vadd.f32 %v1512_v38, %v1375_v45  ;;  %v1540_v41 = vadd.f32 %v1532_v42, %v1376_v32 }
 0x190   :  { %v1563_v53 = vadd.f32 %v1562_v35, %v1558_v51  ;;  %v1572_v46 = vmul.f32 %v1558_v51, %v1538_v50  ;;  %v1559_v54 = vmul.f32 %v1547_v47, %v1539_v43  ;;  %v1560_v56 = vmul.f32 %v1548_v48, %v1540_v41 }
 0x192   :  { %v1577_v57 = vadd.f32 %v1576_v52, %v1572_v46  ;;  %v1573_v55 = vmul.f32 %v1559_v54, %v1539_v43  ;;  %v1564_v58 = vadd.f32 %v1563_v53, %v1559_v54  ;;  %v1574_v59 = vmul.f32 %v1560_v56, %v1540_v41 }
 0x194   :  { %v1565_v60 = vadd.f32 %v1564_v58, %v1560_v56  ;;  %v1578_v61 = vadd.f32 %v1577_v57, %v1573_v55 }
 0x196   :  { %1566 = vadd.xlane.f32.xlu2 %v1565_v60  ;;  %v1579_v62 = vadd.f32 %v1578_v61, %v1574_v59 }
 0x198   :  { %1580 = vadd.xlane.f32.xlu0 %v1579_v62 }
 0x209   :  { %v1567_v63 = vpop.xlane.xlu2 %1566 }
 0x20a   :  { %1568 = vst.msk [vmem:[%s2079_s5] sm:$0xff] %vm593_vm5, %v1567_v63 }
 0x20b   :  { %v1581_v0 = vpop.xlane.xlu0 %1580 }
 0x20c   :  { %1582 = vst.msk [vmem:[%s2080_s6] sm:$0xff] %vm593_vm5, %v1581_v0 }

// kernel: upconv_forward.3
= control target key start
LH: loop header
LB: loop body
LE: loop exit
PB: predicated region body
PF: predicated region fallthrough
CT: control target
= control target key end

     0   :  { %s1722_s27 = smov 18   ;;  %s1725_s30 = smov 1   ;;  %vm114_vm0 = vcmask 146432   ;;  %vm125_vm1 = vcmask 1043456   ;;  %vm121_vm2 = vcmask 31744   ;;  %vm272_vm3 = vcmask 154624   ;;  %s2069_s0 = inlined_call_operand.vmem [shape: f32[4,896], index: 0, kind: input, shape index: {}, may-alias: {0,1,2}]   ;;  %s2070_s1 = inlined_call_operand.vmem [shape: f32[4,896], index: 1, kind: input, shape index: {}, may-alias: {0,1,2}]   ;;  %s2071_s2 = inlined_call_operand.vmem [shape: f32[4,896], index: 2, kind: input, shape index: {}, may-alias: {0,1,2}]   ;;  %s2072_s3 = inlined_call_operand.vmem [shape: f32[9,8,4], index: 3, kind: input, shape index: {}]   ;;  %s2073_s5 = inlined_call_operand.vmem [shape: f32[8,1], index: 5, kind: input, shape index: {}]   ;;  %s2074_s4 = inlined_call_operand.vmem [shape: f32[8,1], index: 4, kind: input, shape index: {}]   ;;  %s2075_s6 = inlined_call_operand.vmem [shape: f32[8,768], index: 6, kind: output, shape index: {}]  }
   0x1   :  { %v77_v0 = vld [vmem:[%s2069_s0] sm:$0xf]  ;;  %v79_v2 = vld [vmem:[%s2070_s1 + $0x8] sm:$0xff]  ;;  %v80_v3 = vld [vmem:[%s2070_s1 + $0x10] sm:$0xff]  ;;  %s1723_s0 = smov 19   ;;  %s1726_s7 = smov 127  }
   0x2   :  { %v78_v1 = vld [vmem:[%s2070_s1] sm:$0xff]  ;;  %100 = vrot.lane.b32.xlu0 %v77_v0, %s1722_s27  ;;  %87 = vst [vmem:[#allocation1 + $0x10] ss:$2 sm:$0xff] %v79_v2  ;;  %s1724_s1 = smov 17   ;;  %v1823_v10 = vld [vmem:[%s2071_s2 + $0x18] sm:$0xf] }
   0x3   :  { %85 = vst [vmem:[#allocation1] ss:$2 sm:$0xff] %v78_v1  ;;  %s1727_s10 = smov 111   ;;  %s1728_s11 = smov 110   ;;  %v1595_v20 = vld [vmem:[%s2072_s3 + $0x8] sm:$0xff]  ;;  %v96_v30 = vld [vmem:[%s2072_s3] sm:$0xff] }
   0x4   :  { %89 = vst [vmem:[#allocation1 + $0x20] ss:$2 sm:$0xff] %v80_v3  ;;  %s1729_s13 = smov 109   ;;  %vm430_vm4 = vcmask 138240   ;;  %v1620_v42 = vld [vmem:[%s2072_s3 + $0x10] sm:$0xff]  ;;  %vm594_vm5 = vcmask 7168  }
   0x5   :  { %v1633_v59 = vld [vmem:[%s2072_s3 + $0x18] sm:$0xff]  ;;  %vm902_vm6 = vcmask 1039360   ;;  %vm1066_vm7 = vcmask 908288   ;;  %vm1230_vm8 = vcmask 900096   ;;  %vm1394_vm9 = vcmask 891904  }
   0x9   :  { %v1784_v6 = vld.sshfl [vmem:[#allocation1 + $0x18] sm:$0xff pattern:$0x75316420]  ;;  %v1787_v7 = vld.sshfl [vmem:[#allocation1 + $0x10] sm:$0xff pattern:$0x75316420] }
   0xa   :  { %v1778_v4 = vld.sshfl [vmem:[#allocation1 + $0x8] sm:$0xff pattern:$0x75316420]  ;;  %v1780_v5 = vld.sshfl [vmem:[#allocation1] sm:$0xff pattern:$0x75316420]  ;;  %108 = vrot.lane.b32.xlu2 %v1784_v6, %s1722_s27 }
   0xb   :  { %104 = vrot.lane.b32.xlu1 %v1778_v4, %s1722_s27  ;;  %102 = vrot.lane.b32.xlu0 %v1780_v5, %s1722_s27  ;;  %v1789_v8 = vld.sshfl [vmem:[#allocation1 + $0x28] sm:$0xff pattern:$0x75316420]  ;;  %v1793_v9 = vld.sshfl [vmem:[#allocation1 + $0x20] sm:$0xff pattern:$0x75316420] }
  0x12   :  { %110 = vrot.lane.b32.xlu2 %v1793_v9, %s1722_s27 }
  0x13   :  { %106 = vrot.lane.b32.xlu1 %v1787_v7, %s1722_s27  ;;  %112 = vrot.lane.b32.xlu0 %v1789_v8, %s1722_s27 }
  0x1a   :  { %260 = vrot.lane.b32.xlu2 %v1780_v5, %s1723_s0 }
  0x1b   :  { %258 = vrot.lane.b32.xlu1 %v77_v0, %s1723_s0  ;;  %262 = vrot.lane.b32.xlu0 %v1778_v4, %s1723_s0 }
  0x22   :  { %266 = vrot.lane.b32.xlu2 %v1784_v6, %s1723_s0 }
  0x23   :  { %264 = vrot.lane.b32.xlu1 %v1787_v7, %s1723_s0  ;;  %268 = vrot.lane.b32.xlu0 %v1793_v9, %s1723_s0 }
  0x2a   :  { %416 = vrot.lane.b32.xlu2 %v77_v0, %s1724_s1 }
  0x2b   :  { %270 = vrot.lane.b32.xlu1 %v1789_v8, %s1723_s0  ;;  %418 = vrot.lane.b32.xlu0 %v1780_v5, %s1724_s1 }
  0x32   :  { %422 = vrot.lane.b32.xlu2 %v1787_v7, %s1724_s1 }
  0x33   :  { %420 = vrot.lane.b32.xlu1 %v1778_v4, %s1724_s1  ;;  %424 = vrot.lane.b32.xlu0 %v1784_v6, %s1724_s1 }
  0x3a   :  { %428 = vrot.lane.b32.xlu2 %v1789_v8, %s1724_s1 }
  0x3b   :  { %426 = vrot.lane.b32.xlu1 %v1793_v9, %s1724_s1  ;;  %580 = vrot.lane.b32.xlu0 %v77_v0, %s1725_s30 }
  0x42   :  { %584 = vrot.lane.b32.xlu2 %v1778_v4, %s1725_s30 }
  0x43   :  { %582 = vrot.lane.b32.xlu1 %v1780_v5, %s1725_s30  ;;  %586 = vrot.lane.b32.xlu0 %v1787_v7, %s1725_s30 }
  0x4a   :  { %590 = vrot.lane.b32.xlu2 %v1793_v9, %s1725_s30 }
  0x4b   :  { %588 = vrot.lane.b32.xlu1 %v1784_v6, %s1725_s30  ;;  %592 = vrot.lane.b32.xlu0 %v1789_v8, %s1725_s30 }
  0x52   :  { %890 = vrot.lane.b32.xlu2 %v1778_v4, %s1726_s7 }
  0x53   :  { %888 = vrot.lane.b32.xlu1 %v1780_v5, %s1726_s7  ;;  %892 = vrot.lane.b32.xlu0 %v1787_v7, %s1726_s7 }
  0x5a   :  { %896 = vrot.lane.b32.xlu2 %v1793_v9, %s1726_s7 }
  0x5b   :  { %894 = vrot.lane.b32.xlu1 %v1784_v6, %s1726_s7  ;;  %898 = vrot.lane.b32.xlu0 %v1789_v8, %s1726_s7 }
  0x62   :  { %1052 = vrot.lane.b32.xlu2 %v1780_v5, %s1727_s10 }
  0x63   :  { %900 = vrot.lane.b32.xlu1 %v1823_v10, %s1726_s7  ;;  %1054 = vrot.lane.b32.xlu0 %v1778_v4, %s1727_s10 }
  0x64   :  { %v109_v11 = vpop.permute.xlu2 %108 }
  0x6a   :  { %1058 = vrot.lane.b32.xlu2 %v1784_v6, %s1727_s10 }
  0x6b   :  { %1056 = vrot.lane.b32.xlu1 %v1787_v7, %s1727_s10  ;;  %1060 = vrot.lane.b32.xlu0 %v1793_v9, %s1727_s10 }
  0x6c   :  { %v111_v12 = vpop.permute.xlu2 %110 }
  0x6d   :  { %v119_v17 = vsel %vm114_vm0, %v109_v11, %v111_v12 }
  0x72   :  { %1064 = vrot.lane.b32.xlu2 %v1823_v10, %s1727_s10 }
  0x73   :  { %1062 = vrot.lane.b32.xlu1 %v1789_v8, %s1727_s10  ;;  %1216 = vrot.lane.b32.xlu0 %v1780_v5, %s1728_s11 }
  0x74   :  { %v101_v13 = vpop.permute.xlu0 %100  ;;  %v261_v14 = vpop.permute.xlu2 %260 }
  0x7a   :  { %1220 = vrot.lane.b32.xlu2 %v1787_v7, %s1728_s11 }
  0x7b   :  { %1218 = vrot.lane.b32.xlu1 %v1778_v4, %s1728_s11  ;;  %1222 = vrot.lane.b32.xlu0 %v1784_v6, %s1728_s11 }
  0x7c   :  { %v267_v21 = vpop.permute.xlu2 %266 }
  0x7d   :  { %v105_v15 = vpop.permute.xlu1 %104  ;;  %v103_v16 = vpop.permute.xlu0 %102 }
  0x7e   :  { %v115_v18 = vsel %vm114_vm0, %v101_v13, %v103_v16  ;;  %v116_v19 = vsel %vm114_vm0, %v103_v16, %v105_v15  ;;  %v1659_v16 = vld [vmem:[%s2072_s3 + $0x28] sm:$0xff] }
  0x7f   :  { %1596 = vmatpush.msk.msra.mxu0 %vm125_vm1, %v115_v18  ;;  %1598 = vmatpush.msk.msra.mxu1 %vm125_vm1, %v116_v19 }
  0x80   :  { %1599 = vmatmul.msk.f32.vlgmr.msra.gmra.mxu1 %vm121_vm2, %v1595_v20  ;;  %1597 = vmatmul.msk.f32.vlgmr.msra.gmra.mxu0 %vm121_vm2, %v1595_v20 }
  0x81   :  { %1604 = vmatpush.msk.msrb.mxu0 %vm125_vm1, %v119_v17 }
  0x82   :  { %1226 = vrot.lane.b32.xlu2 %v1789_v8, %s1728_s11 }
  0x83   :  { %1224 = vrot.lane.b32.xlu1 %v1793_v9, %s1728_s11  ;;  %1228 = vrot.lane.b32.xlu0 %v1823_v10, %s1728_s11 }
  0x84   :  { %v417_v27 = vpop.permute.xlu2 %416 }
  0x85   :  { %v107_v22 = vpop.permute.xlu1 %106  ;;  %v113_v23 = vpop.permute.xlu0 %112 }
  0x86   :  { %v117_v24 = vsel %vm114_vm0, %v105_v15, %v107_v22  ;;  %v118_v25 = vsel %vm114_vm0, %v107_v22, %v109_v11  ;;  %v120_v26 = vsel %vm114_vm0, %v111_v12, %v113_v23  ;;  %v1672_v22 = vld [vmem:[%s2072_s3 + $0x30] sm:$0xff] }
  0x87   :  { %1600 = vmatpush.msk.msra.mxu2 %vm125_vm1, %v117_v24  ;;  %1602 = vmatpush.msk.msra.mxu3 %vm125_vm1, %v118_v25 }
  0x88   :  { %1606 = vmatpush.msk.msrb.mxu1 %vm125_vm1, %v120_v26  ;;  %1601 = vmatmul.msk.f32.vlgmr.msra.gmra.mxu2 %vm121_vm2, %v1595_v20 }
  0x89   :  { %1603 = vmatmul.msk.f32.vlgmr.msra.gmra.mxu3 %vm121_vm2, %v1595_v20  ;;  %1605 = vmatmul.msk.f32.vlgmr.msrb.gmra.mxu0 %vm121_vm2, %v1595_v20 }
  0x8a   :  { %1607 = vmatmul.msk.f32.vlgmr.msrb.gmra.mxu1 %vm121_vm2, %v1595_v20  ;;  %1382 = vrot.lane.b32.xlu2 %v1778_v4, %s1729_s13 }
  0x8b   :  { %1380 = vrot.lane.b32.xlu1 %v1780_v5, %s1729_s13  ;;  %1384 = vrot.lane.b32.xlu0 %v1787_v7, %s1729_s13 }
  0x8c   :  { %v423_v33 = vpop.permute.xlu2 %422 }
  0x8d   :  { %v259_v28 = vpop.permute.xlu1 %258  ;;  %v263_v29 = vpop.permute.xlu0 %262 }
  0x8e   :  { %v273_v31 = vsel %vm272_vm3, %v259_v28, %v261_v14  ;;  %v274_v32 = vsel %vm272_vm3, %v261_v14, %v263_v29 }
  0x8f   :  { %1608 = vmatpush.msk.msrb.mxu2 %vm125_vm1, %v273_v31  ;;  %1610 = vmatpush.msk.msrb.mxu3 %vm125_vm1, %v274_v32 }
  0x90   :  { %1609 = vmatmul.msk.f32.vlgmr.msrb.gmra.mxu2 %vm121_vm2, %v96_v30 }
  0x91   :  { %1611 = vmatmul.msk.f32.vlgmr.msrb.gmra.mxu3 %vm121_vm2, %v96_v30 }
  0x92   :  { %1388 = vrot.lane.b32.xlu2 %v1793_v9, %s1729_s13 }
  0x93   :  { %1386 = vrot.lane.b32.xlu1 %v1784_v6, %s1729_s13  ;;  %1390 = vrot.lane.b32.xlu0 %v1789_v8, %s1729_s13 }
  0x94   :  { %v429_v39 = vpop.permute.xlu2 %428 }
  0x95   :  { %v265_v34 = vpop.permute.xlu1 %264  ;;  %v269_v35 = vpop.permute.xlu0 %268 }
  0x96   :  { %v275_v36 = vsel %vm272_vm3, %v263_v29, %v265_v34  ;;  %v276_v37 = vsel %vm272_vm3, %v265_v34, %v267_v21  ;;  %v277_v38 = vsel %vm272_vm3, %v267_v21, %v269_v35 }
  0x97   :  { %1612 = vmatpush.msk.msra.mxu0 %vm125_vm1, %v275_v36  ;;  %1614 = vmatpush.msk.msra.mxu1 %vm125_vm1, %v276_v37  ;;  %v1685_v36 = vld [vmem:[%s2072_s3 + $0x38] sm:$0xff] }
  0x98   :  { %1616 = vmatpush.msk.msra.mxu2 %vm125_vm1, %v277_v38  ;;  %1613 = vmatmul.msk.f32.vlgmr.msra.gmra.mxu0 %vm121_vm2, %v96_v30 }
  0x99   :  { %1615 = vmatmul.msk.f32.vlgmr.msra.gmra.mxu1 %vm121_vm2, %v96_v30  ;;  %1617 = vmatmul.msk.f32.vlgmr.msra.gmra.mxu2 %vm121_vm2, %v96_v30 }
  0x9b   :  { %1392 = vrot.lane.b32.xlu1 %v1823_v10, %s1729_s13 }
  0x9c   :  { %v585_v45 = vpop.permute.xlu2 %584 }
  0x9d   :  { %v271_v40 = vpop.permute.xlu1 %270  ;;  %v419_v41 = vpop.permute.xlu0 %418 }
  0x9e   :  { %v278_v43 = vsel %vm272_vm3, %v269_v35, %v271_v40  ;;  %v431_v44 = vsel %vm430_vm4, %v417_v27, %v419_v41 }
  0x9f   :  { %1618 = vmatpush.msk.msra.mxu3 %vm125_vm1, %v278_v43  ;;  %1621 = vmatpush.msk.msrb.mxu0 %vm125_vm1, %v431_v44 }
  0xa0   :  { %1619 = vmatmul.msk.f32.vlgmr.msra.gmra.mxu3 %vm121_vm2, %v96_v30  ;;  %1622 = vmatmul.msk.f32.vlgmr.msrb.gmra.mxu0 %vm121_vm2, %v1620_v42 }
  0xa4   :  { %v591_v51 = vpop.permute.xlu2 %590 }
  0xa5   :  { %v421_v46 = vpop.permute.xlu1 %420  ;;  %v425_v47 = vpop.permute.xlu0 %424 }
  0xa6   :  { %v432_v48 = vsel %vm430_vm4, %v419_v41, %v421_v46  ;;  %v433_v49 = vsel %vm430_vm4, %v421_v46, %v423_v33  ;;  %v434_v50 = vsel %vm430_vm4, %v423_v33, %v425_v47  ;;  %v1554_v41 = vld [vmem:[%s2073_s5] sm:$0xff] }
  0xa7   :  { %1623 = vmatpush.msk.msrb.mxu1 %vm125_vm1, %v432_v48  ;;  %1625 = vmatpush.msk.msrb.mxu2 %vm125_vm1, %v433_v49  ;;  %v1542_v48 = vld [vmem:[%s2074_s4] sm:$0xff] }
  0xa8   :  { %1627 = vmatpush.msk.msrb.mxu3 %vm125_vm1, %v434_v50  ;;  %1624 = vmatmul.msk.f32.vlgmr.msrb.gmra.mxu1 %vm121_vm2, %v1620_v42 }
  0xa9   :  { %1626 = vmatmul.msk.f32.vlgmr.msrb.gmra.mxu2 %vm121_vm2, %v1620_v42  ;;  %1628 = vmatmul.msk.f32.vlgmr.msrb.gmra.mxu3 %vm121_vm2, %v1620_v42 }
  0xac   :  { %v891_v56 = vpop.permute.xlu2 %890 }
  0xad   :  { %v427_v52 = vpop.permute.xlu1 %426  ;;  %v581_v53 = vpop.permute.xlu0 %580 }
  0xae   :  { %v435_v54 = vsel %vm430_vm4, %v425_v47, %v427_v52  ;;  %v436_v55 = vsel %vm430_vm4, %v427_v52, %v429_v39  ;;  %v1698_v52 = vld [vmem:[%s2072_s3 + $0x40] sm:$0xff] }
  0xaf   :  { %1629 = vmatpush.msk.msra.mxu0 %vm125_vm1, %v435_v54  ;;  %1631 = vmatpush.msk.msra.mxu1 %vm125_vm1, %v436_v55 }
  0xb0   :  { %1630 = vmatmul.msk.f32.vlgmr.msra.gmra.mxu0 %vm121_vm2, %v1620_v42  ;;  %1632 = vmatmul.msk.f32.vlgmr.msra.gmra.mxu1 %vm121_vm2, %v1620_v42  ;;  %v1730_v42 = vmov 0  }
  0xb1   :  { %1721 = vset.pattern.permute.xlu0 %v1730_v42  ;;  %1720 = vset.pattern.permute.xlu2 %v1730_v42 }
  0xb2   :  { %1557 = vperm.xlu0 %1721, %v1554_v41   ;;  %1545 = vperm.xlu2 %1720, %v1542_v48  }
  0xb4   :  { %v897_v63 = vpop.permute.xlu2 %896 }
  0xb5   :  { %v583_v57 = vpop.permute.xlu1 %582  ;;  %v587_v58 = vpop.permute.xlu0 %586 }
  0xb6   :  { %v595_v60 = vsel %vm594_vm5, %v581_v53, %v583_v57  ;;  %v596_v61 = vsel %vm594_vm5, %v583_v57, %v585_v45  ;;  %v597_v62 = vsel %vm594_vm5, %v585_v45, %v587_v58 }
  0xb7   :  { %1634 = vmatpush.msk.msra.mxu2 %vm125_vm1, %v595_v60  ;;  %1636 = vmatpush.msk.msra.mxu3 %vm125_vm1, %v596_v61 }
  0xb8   :  { %1638 = vmatpush.msk.msrb.mxu0 %vm125_vm1, %v597_v62  ;;  %1635 = vmatmul.msk.f32.vlgmr.msra.gmra.mxu2 %vm121_vm2, %v1633_v59 }
  0xb9   :  { %1637 = vmatmul.msk.f32.vlgmr.msra.gmra.mxu3 %vm121_vm2, %v1633_v59  ;;  %1639 = vmatmul.msk.f32.vlgmr.msrb.gmra.mxu0 %vm121_vm2, %v1633_v59 }
  0xba   :  { %1647 = vmatpush.msk.msra.mxu0 %vm125_vm1, %v1780_v5  ;;  %v1646_v5 = vld [vmem:[%s2072_s3 + $0x20] sm:$0xff] }
  0xbc   :  { %1655 = vmatpush.msk.msrb.mxu0 %vm125_vm1, %v1793_v9  ;;  %v1053_v14 = vpop.permute.xlu2 %1052 }
  0xbd   :  { %v589_v0 = vpop.permute.xlu1 %588  ;;  %v593_v1 = vpop.permute.xlu0 %592 }
  0xbe   :  { %v598_v2 = vsel %vm594_vm5, %v587_v58, %v589_v0  ;;  %v599_v3 = vsel %vm594_vm5, %v589_v0, %v591_v51  ;;  %v600_v10 = vsel %vm594_vm5, %v591_v51, %v593_v1 }
  0xbf   :  { %1640 = vmatpush.msk.msrb.mxu1 %vm125_vm1, %v598_v2  ;;  %1642 = vmatpush.msk.msrb.mxu2 %vm125_vm1, %v599_v3 }
  0xc0   :  { %1644 = vmatpush.msk.msrb.mxu3 %vm125_vm1, %v600_v10  ;;  %1641 = vmatmul.msk.f32.vlgmr.msrb.gmra.mxu1 %vm121_vm2, %v1633_v59 }
  0xc1   :  { %1643 = vmatmul.msk.f32.vlgmr.msrb.gmra.mxu2 %vm121_vm2, %v1633_v59  ;;  %1645 = vmatmul.msk.f32.vlgmr.msrb.gmra.mxu3 %vm121_vm2, %v1633_v59 }
  0xc2   :  { %1648 = vmatmul.msk.f32.vlgmr.msra.gmra.mxu0 %vm121_vm2, %v1646_v5  ;;  %1651 = vmatpush.msk.msra.mxu2 %vm125_vm1, %v1787_v7 }
  0xc3   :  { %1649 = vmatpush.msk.msra.mxu1 %vm125_vm1, %v1778_v4  ;;  %1653 = vmatpush.msk.msra.mxu3 %vm125_vm1, %v1784_v6 }
  0xc4   :  { %v1059_v17 = vpop.permute.xlu2 %1058 }
  0xc5   :  { %1657 = vmatpush.msk.msrb.mxu1 %vm125_vm1, %v1789_v8  ;;  %v889_v9 = vpop.permute.xlu1 %888  ;;  %v893_v11 = vpop.permute.xlu0 %892 }
  0xc6   :  { %v903_v12 = vsel %vm902_vm6, %v889_v9, %v891_v56  ;;  %v904_v13 = vsel %vm902_vm6, %v891_v56, %v893_v11 }
  0xc7   :  { %1660 = vmatpush.msk.msrb.mxu2 %vm125_vm1, %v903_v12  ;;  %1662 = vmatpush.msk.msrb.mxu3 %vm125_vm1, %v904_v13 }
  0xc8   :  { %1650 = vmatmul.msk.f32.vlgmr.msra.gmra.mxu1 %vm121_vm2, %v1646_v5 }
  0xc9   :  { %1652 = vmatmul.msk.f32.vlgmr.msra.gmra.mxu2 %vm121_vm2, %v1646_v5  ;;  %1654 = vmatmul.msk.f32.vlgmr.msra.gmra.mxu3 %vm121_vm2, %v1646_v5 }
  0xca   :  { %1656 = vmatmul.msk.f32.vlgmr.msrb.gmra.mxu0 %vm121_vm2, %v1646_v5 }
  0xcc   :  { %v1065_v23 = vpop.permute.xlu2 %1064 }
  0xcd   :  { %v895_v4 = vpop.permute.xlu1 %894  ;;  %v899_v6 = vpop.permute.xlu0 %898 }
  0xce   :  { %v905_v7 = vsel %vm902_vm6, %v893_v11, %v895_v4  ;;  %v906_v8 = vsel %vm902_vm6, %v895_v4, %v897_v63  ;;  %v907_v15 = vsel %vm902_vm6, %v897_v63, %v899_v6 }
  0xcf   :  { %1664 = vmatpush.msk.msra.mxu0 %vm125_vm1, %v905_v7  ;;  %1666 = vmatpush.msk.msra.mxu1 %vm125_vm1, %v906_v8 }
  0xd0   :  { %1658 = vmatmul.msk.f32.vlgmr.msrb.gmra.mxu1 %vm121_vm2, %v1646_v5  ;;  %1668 = vmatpush.msk.msra.mxu2 %vm125_vm1, %v907_v15 }
  0xd1   :  { %1661 = vmatmul.msk.f32.vlgmr.msrb.gmra.mxu2 %vm121_vm2, %v1659_v16  ;;  %1663 = vmatmul.msk.f32.vlgmr.msrb.gmra.mxu3 %vm121_vm2, %v1659_v16 }
  0xd2   :  { %1665 = vmatmul.msk.f32.vlgmr.msra.gmra.mxu0 %vm121_vm2, %v1659_v16 }
  0xd4   :  { %v1221_v29 = vpop.permute.xlu2 %1220 }
  0xd5   :  { %v901_v18 = vpop.permute.xlu1 %900  ;;  %v1055_v19 = vpop.permute.xlu0 %1054 }
  0xd6   :  { %v908_v20 = vsel %vm902_vm6, %v899_v6, %v901_v18  ;;  %v1067_v21 = vsel %vm1066_vm7, %v1053_v14, %v1055_v19 }
  0xd7   :  { %1670 = vmatpush.msk.msra.mxu3 %vm125_vm1, %v908_v20  ;;  %1673 = vmatpush.msk.msrb.mxu0 %vm125_vm1, %v1067_v21 }
  0xd8   :  { %1667 = vmatmul.msk.f32.vlgmr.msra.gmra.mxu1 %vm121_vm2, %v1659_v16 }
  0xd9   :  { %1669 = vmatmul.msk.f32.vlgmr.msra.gmra.mxu2 %vm121_vm2, %v1659_v16  ;;  %1671 = vmatmul.msk.f32.vlgmr.msra.gmra.mxu3 %vm121_vm2, %v1659_v16 }
  0xda   :  { %1674 = vmatmul.msk.f32.vlgmr.msrb.gmra.mxu0 %vm121_vm2, %v1672_v22 }
  0xdc   :  { %v1227_v40 = vpop.permute.xlu2 %1226 }
  0xdd   :  { %v1057_v24 = vpop.permute.xlu1 %1056  ;;  %v1061_v25 = vpop.permute.xlu0 %1060 }
  0xde   :  { %v1068_v26 = vsel %vm1066_vm7, %v1055_v19, %v1057_v24  ;;  %v1069_v27 = vsel %vm1066_vm7, %v1057_v24, %v1059_v17  ;;  %v1070_v28 = vsel %vm1066_vm7, %v1059_v17, %v1061_v25 }
  0xdf   :  { %1675 = vmatpush.msk.msrb.mxu1 %vm125_vm1, %v1068_v26  ;;  %1677 = vmatpush.msk.msrb.mxu2 %vm125_vm1, %v1069_v27 }
  0xe0   :  { %1679 = vmatpush.msk.msrb.mxu3 %vm125_vm1, %v1070_v28  ;;  %1676 = vmatmul.msk.f32.vlgmr.msrb.gmra.mxu1 %vm121_vm2, %v1672_v22 }
  0xe1   :  { %1678 = vmatmul.msk.f32.vlgmr.msrb.gmra.mxu2 %vm121_vm2, %v1672_v22  ;;  %1680 = vmatmul.msk.f32.vlgmr.msrb.gmra.mxu3 %vm121_vm2, %v1672_v22 }
  0xe4   :  { %v1383_v49 = vpop.permute.xlu2 %1382 }
  0xe5   :  { %v1063_v30 = vpop.permute.xlu1 %1062  ;;  %v1217_v31 = vpop.permute.xlu0 %1216 }
  0xe6   :  { %v1071_v32 = vsel %vm1066_vm7, %v1061_v25, %v1063_v30  ;;  %v1072_v33 = vsel %vm1066_vm7, %v1063_v30, %v1065_v23 }
  0xe7   :  { %1681 = vmatpush.msk.msra.mxu0 %vm125_vm1, %v1071_v32  ;;  %1683 = vmatpush.msk.msra.mxu1 %vm125_vm1, %v1072_v33 }
  0xe8   :  { %1682 = vmatmul.msk.f32.vlgmr.msra.gmra.mxu0 %vm121_vm2, %v1672_v22  ;;  %1684 = vmatmul.msk.f32.vlgmr.msra.gmra.mxu1 %vm121_vm2, %v1672_v22 }
  0xec   :  { %v1389_v57 = vpop.permute.xlu2 %1388 }
  0xed   :  { %v1219_v34 = vpop.permute.xlu1 %1218  ;;  %v1223_v35 = vpop.permute.xlu0 %1222 }
  0xee   :  { %v1231_v37 = vsel %vm1230_vm8, %v1217_v31, %v1219_v34  ;;  %v1232_v38 = vsel %vm1230_vm8, %v1219_v34, %v1221_v29  ;;  %v1233_v39 = vsel %vm1230_vm8, %v1221_v29, %v1223_v35 }
  0xef   :  { %1686 = vmatpush.msk.msra.mxu2 %vm125_vm1, %v1231_v37  ;;  %1688 = vmatpush.msk.msra.mxu3 %vm125_vm1, %v1232_v38 }
  0xf0   :  { %1690 = vmatpush.msk.msrb.mxu0 %vm125_vm1, %v1233_v39  ;;  %1687 = vmatmul.msk.f32.vlgmr.msra.gmra.mxu2 %vm121_vm2, %v1685_v36 }
  0xf1   :  { %1689 = vmatmul.msk.f32.vlgmr.msra.gmra.mxu3 %vm121_vm2, %v1685_v36  ;;  %1691 = vmatmul.msk.f32.vlgmr.msrb.gmra.mxu0 %vm121_vm2, %v1685_v36 }
  0xf5   :  { %v1225_v43 = vpop.permute.xlu1 %1224  ;;  %v1229_v44 = vpop.permute.xlu0 %1228 }
  0xf6   :  { %v1234_v45 = vsel %vm1230_vm8, %v1223_v35, %v1225_v43  ;;  %v1235_v46 = vsel %vm1230_vm8, %v1225_v43, %v1227_v40  ;;  %v1236_v47 = vsel %vm1230_vm8, %v1227_v40, %v1229_v44 }
  0xf7   :  { %1692 = vmatpush.msk.msrb.mxu1 %vm125_vm1, %v1234_v45  ;;  %1694 = vmatpush.msk.msrb.mxu2 %vm125_vm1, %v1235_v46 }
  0xf8   :  { %1696 = vmatpush.msk.msrb.mxu3 %vm125_vm1, %v1236_v47  ;;  %1693 = vmatmul.msk.f32.vlgmr.msrb.gmra.mxu1 %vm121_vm2, %v1685_v36 }
  0xf9   :  { %1695 = vmatmul.msk.f32.vlgmr.msrb.gmra.mxu2 %vm121_vm2, %v1685_v36  ;;  %1697 = vmatmul.msk.f32.vlgmr.msrb.gmra.mxu3 %vm121_vm2, %v1685_v36 }
  0xfd   :  { %v1381_v50 = vpop.permute.xlu1 %1380  ;;  %v1385_v51 = vpop.permute.xlu0 %1384 }
  0xfe   :  { %v1395_v53 = vsel %vm1394_vm9, %v1381_v50, %v1383_v49  ;;  %v1396_v54 = vsel %vm1394_vm9, %v1383_v49, %v1385_v51  ;;  %v155_v55 = vpop.f32.mrf.mxu0  ;;  %v175_v56 = vpop.f32.mrf.mxu1 }
  0xff   :  { %1699 = vmatpush.msk.msra.mxu0 %vm125_vm1, %v1395_v53  ;;  %1701 = vmatpush.msk.msra.mxu1 %vm125_vm1, %v1396_v54 }
 0x100   :  { %1700 = vmatmul.msk.f32.vlgmr.msra.gmra.mxu0 %vm121_vm2, %v1698_v52  ;;  %1702 = vmatmul.msk.f32.vlgmr.msra.gmra.mxu1 %vm121_vm2, %v1698_v52 }
 0x105   :  { %v1387_v58 = vpop.permute.xlu1 %1386  ;;  %v1391_v59 = vpop.permute.xlu0 %1390 }
 0x106   :  { %v1397_v60 = vsel %vm1394_vm9, %v1385_v51, %v1387_v58  ;;  %v1398_v61 = vsel %vm1394_vm9, %v1387_v58, %v1389_v57  ;;  %v1399_v62 = vsel %vm1394_vm9, %v1389_v57, %v1391_v59  ;;  %v235_v63 = vpop.f32.mrf.mxu0 }
 0x107   :  { %1703 = vmatpush.msk.msra.mxu2 %vm125_vm1, %v1397_v60  ;;  %1705 = vmatpush.msk.msra.mxu3 %vm125_vm1, %v1398_v61  ;;  %v255_v0 = vpop.f32.mrf.mxu1 }
 0x108   :  { %1707 = vmatpush.msk.msrb.mxu0 %vm125_vm1, %v1399_v62  ;;  %1704 = vmatmul.msk.f32.vlgmr.msra.gmra.mxu2 %vm121_vm2, %v1698_v52 }
 0x109   :  { %1706 = vmatmul.msk.f32.vlgmr.msra.gmra.mxu3 %vm121_vm2, %v1698_v52  ;;  %1708 = vmatmul.msk.f32.vlgmr.msrb.gmra.mxu0 %vm121_vm2, %v1698_v52 }
 0x10b   :  { %v195_v10 = vpop.f32.mrf.mxu2 }
 0x10c   :  { %v215_v3 = vpop.f32.mrf.mxu3 }
 0x10d   :  { %v1393_v1 = vpop.permute.xlu1 %1392 }
 0x10e   :  { %v1400_v2 = vsel %vm1394_vm9, %v1391_v59, %v1393_v1 }
 0x10f   :  { %1709 = vmatpush.msk.msrb.mxu1 %vm125_vm1, %v1400_v2 }
 0x110   :  { %1710 = vmatmul.msk.f32.vlgmr.msrb.gmra.mxu1 %vm121_vm2, %v1698_v52 }
 0x113   :  { %v311_v14 = vpop.f32.mrf.mxu2 }
 0x114   :  { %v331_v13 = vpop.f32.mrf.mxu3  ;;  %v312_v41 = vadd.f32 %v311_v14, %v155_v55 }
 0x115   :  { %v351_v5 = vpop.f32.mrf.mxu0  ;;  %v332_v44 = vadd.f32 %v331_v13, %v175_v56 }
 0x116   :  { %v2042_v9 = vadd.f32 %v351_v5, %v195_v10  ;;  %v371_v11 = vpop.f32.mrf.mxu1 }
 0x117   :  { %v2044_v12 = vadd.f32 %v371_v11, %v215_v3  ;;  %v1546_v3 = vpop.permute.xlu2 %1545 }
 0x11c   :  { %v391_v15 = vpop.f32.mrf.mxu2 }
 0x11d   :  { %v469_v8 = vpop.f32.mrf.mxu0  ;;  %v392_v52 = vadd.f32 %v391_v15, %v235_v63 }
 0x11e   :  { %v572_v45 = vadd.f32 %v469_v8, %v312_v41 }
 0x123   :  { %v411_v4 = vpop.f32.mrf.mxu3 }
 0x124   :  { %v412_v6 = vadd.f32 %v411_v4, %v255_v0  ;;  %v1558_v4 = vpop.permute.xlu0 %1557 }
 0x125   :  { %v489_v7 = vpop.f32.mrf.mxu1 }
 0x126   :  { %v573_v49 = vadd.f32 %v489_v7, %v332_v44 }
 0x12c   :  { %v509_v19 = vpop.f32.mrf.mxu2  ;;  %v529_v20 = vpop.f32.mrf.mxu3 }
 0x12d   :  { %v569_v16 = vpop.f32.mrf.mxu1  ;;  %v549_v18 = vpop.f32.mrf.mxu0  ;;  %v574_v11 = vadd.f32 %v509_v19, %v2042_v9  ;;  %v575_v15 = vadd.f32 %v529_v20, %v2044_v12 }
 0x12e   :  { %v2046_v17 = vadd.f32 %v569_v16, %v412_v6  ;;  %v576_v61 = vadd.f32 %v549_v18, %v392_v52 }
 0x136   :  { %v673_v21 = vpop.f32.mrf.mxu0 }
 0x137   :  { %v738_v6 = vadd.f32 %v673_v21, %v574_v11 }
 0x13b   :  { %v633_v23 = vpop.f32.mrf.mxu2 }
 0x13c   :  { %v653_v24 = vpop.f32.mrf.mxu3  ;;  %v736_v46 = vadd.f32 %v633_v23, %v572_v45 }
 0x13d   :  { %v693_v22 = vpop.f32.mrf.mxu1  ;;  %v737_v50 = vadd.f32 %v653_v24, %v573_v49 }
 0x13f   :  { %v776_v25 = vpop.f32.mrf.mxu0 }
 0x140   :  { %v879_v51 = vadd.f32 %v776_v25, %v736_v46 }
 0x144   :  { %v713_v27 = vpop.f32.mrf.mxu2  ;;  %v733_v28 = vpop.f32.mrf.mxu3 }
 0x145   :  { %v796_v26 = vpop.f32.mrf.mxu1  ;;  %v740_v1 = vadd.f32 %v713_v27, %v576_v61 }
 0x146   :  { %v880_v57 = vadd.f32 %v796_v26, %v737_v50  ;;  %v739_v26 = vadd.f32 %v693_v22, %v575_v15 }
 0x147   :  { %v856_v29 = vpop.f32.mrf.mxu0 }
 0x148   :  { %v883_v14 = vadd.f32 %v856_v29, %v740_v1 }
 0x14c   :  { %v816_v31 = vpop.f32.mrf.mxu2  ;;  %v836_v32 = vpop.f32.mrf.mxu3 }
 0x14d   :  { %v876_v30 = vpop.f32.mrf.mxu1  ;;  %v881_v18 = vadd.f32 %v816_v31, %v738_v6 }
 0x14f   :  { %v981_v33 = vpop.f32.mrf.mxu0 }
 0x150   :  { %v1046_v21 = vadd.f32 %v981_v33, %v881_v18 }
 0x154   :  { %v941_v35 = vpop.f32.mrf.mxu2  ;;  %v961_v36 = vpop.f32.mrf.mxu3 }
 0x155   :  { %v1001_v34 = vpop.f32.mrf.mxu1  ;;  %v1044_v58 = vadd.f32 %v941_v35, %v879_v51  ;;  %v1045_v59 = vadd.f32 %v961_v36, %v880_v57  ;;  %v741_v35 = vadd.f32 %v733_v28, %v2046_v17 }
 0x157   :  { %v1105_v37 = vpop.f32.mrf.mxu0 }
 0x158   :  { %v1208_v55 = vadd.f32 %v1105_v37, %v1044_v58  ;;  %v882_v37 = vadd.f32 %v836_v32, %v739_v26 }
 0x15a   :  { %v1047_v20 = vadd.f32 %v1001_v34, %v882_v37 }
 0x15c   :  { %v1021_v39 = vpop.f32.mrf.mxu2  ;;  %v1041_v40 = vpop.f32.mrf.mxu3 }
 0x15d   :  { %v1125_v38 = vpop.f32.mrf.mxu1  ;;  %v1048_v16 = vadd.f32 %v1021_v39, %v883_v14 }
 0x15e   :  { %v1209_v0 = vadd.f32 %v1125_v38, %v1045_v59  ;;  %v884_v38 = vadd.f32 %v876_v30, %v741_v35 }
 0x160   :  { %v1049_v31 = vadd.f32 %v1041_v40, %v884_v38 }
 0x164   :  { %v1145_v47 = vpop.f32.mrf.mxu2  ;;  %v1165_v48 = vpop.f32.mrf.mxu3 }
 0x165   :  { %v1185_v42 = vpop.f32.mrf.mxu0  ;;  %v1205_v43 = vpop.f32.mrf.mxu1  ;;  %v1210_v17 = vadd.f32 %v1145_v47, %v1046_v21  ;;  %v1211_v28 = vadd.f32 %v1165_v48, %v1047_v20 }
 0x166   :  { %v1212_v27 = vadd.f32 %v1185_v42, %v1048_v16  ;;  %v1213_v41 = vadd.f32 %v1205_v43, %v1049_v31 }
 0x16e   :  { %v1309_v53 = vpop.f32.mrf.mxu0 }
 0x16f   :  { %v1374_v32 = vadd.f32 %v1309_v53, %v1210_v17 }
 0x173   :  { %v1269_v60 = vpop.f32.mrf.mxu2 }
 0x174   :  { %v1289_v62 = vpop.f32.mrf.mxu3  ;;  %v1372_v56 = vadd.f32 %v1269_v60, %v1208_v55 }
 0x175   :  { %v1329_v54 = vpop.f32.mrf.mxu1  ;;  %v1373_v2 = vadd.f32 %v1289_v62, %v1209_v0 }
 0x176   :  { %v1375_v42 = vadd.f32 %v1329_v54, %v1211_v28 }
 0x17c   :  { %v1349_v23 = vpop.f32.mrf.mxu2  ;;  %v1369_v36 = vpop.f32.mrf.mxu3 }
 0x17d   :  { %v1433_v10 = vpop.f32.mrf.mxu0  ;;  %v1453_v5 = vpop.f32.mrf.mxu1  ;;  %v1376_v29 = vadd.f32 %v1349_v23, %v1212_v27  ;;  %v1377_v44 = vadd.f32 %v1369_v36, %v1213_v41 }
 0x17e   :  { %v1536_v13 = vadd.f32 %v1433_v10, %v1372_v56  ;;  %v1537_v63 = vadd.f32 %v1453_v5, %v1373_v2 }
 0x180   :  { %v1548_v7 = vmul.f32 %v1546_v3, %v1536_v13  ;;  %v1549_v8 = vmul.f32 %v1546_v3, %v1537_v63 }
 0x182   :  { %v1560_v24 = vadd.f32 %v1558_v4, %v1548_v7  ;;  %v1561_v25 = vadd.f32 %v1558_v4, %v1549_v8 }
 0x184   :  { %v1566_v9 = vmax.f32 %v1560_v24, 0.0  ;;  %v1567_v19 = vmax.f32 %v1561_v25, 0.0 }
 0x186   :  { %1572 = vst [vmem:[%s2075_s6] sm:$0xff] %v1566_v9  ;;  %v1513_v12 = vpop.f32.mrf.mxu0 }
 0x187   :  { %1573 = vst [vmem:[%s2075_s6 + $0x8] sm:$0xff] %v1567_v19  ;;  %v1540_v22 = vadd.f32 %v1513_v12, %v1376_v29 }
 0x189   :  { %v1552_v39 = vmul.f32 %v1546_v3, %v1540_v22 }
 0x18b   :  { %v1564_v30 = vadd.f32 %v1558_v4, %v1552_v39  ;;  %v1473_v33 = vpop.f32.mrf.mxu2 }
 0x18c   :  { %v1538_v45 = vadd.f32 %v1473_v33, %v1374_v32  ;;  %v1493_v46 = vpop.f32.mrf.mxu3 }
 0x18d   :  { %v1570_v49 = vmax.f32 %v1564_v30, 0.0  ;;  %v1539_v50 = vadd.f32 %v1493_v46, %v1375_v42  ;;  %v1533_v34 = vpop.f32.mrf.mxu1 }
 0x18e   :  { %v1550_v51 = vmul.f32 %v1546_v3, %v1538_v45  ;;  %v1541_v52 = vadd.f32 %v1533_v34, %v1377_v44 }
 0x18f   :  { %1576 = vst [vmem:[%s2075_s6 + $0x20] sm:$0xff] %v1570_v49  ;;  %v1551_v40 = vmul.f32 %v1546_v3, %v1539_v50 }
 0x190   :  { %v1562_v47 = vadd.f32 %v1558_v4, %v1550_v51  ;;  %v1553_v48 = vmul.f32 %v1546_v3, %v1541_v52 }
 0x191   :  { %v1563_v43 = vadd.f32 %v1558_v4, %v1551_v40 }
 0x192   :  { %v1568_v53 = vmax.f32 %v1562_v47, 0.0  ;;  %v1565_v54 = vadd.f32 %v1558_v4, %v1553_v48 }
 0x193   :  { %v1569_v57 = vmax.f32 %v1563_v43, 0.0 }
 0x194   :  { %1574 = vst [vmem:[%s2075_s6 + $0x10] sm:$0xff] %v1568_v53  ;;  %v1571_v58 = vmax.f32 %v1565_v54, 0.0 }
 0x195   :  { %1575 = vst [vmem:[%s2075_s6 + $0x18] sm:$0xff] %v1569_v57 }
 0x196   :  { %1577 = vst [vmem:[%s2075_s6 + $0x28] sm:$0xff] %v1571_v58 }

</bundles_post_ra>
